<compile_context>
chip_gen: v7x
topology: tpu7x:2x2x1
jax: 0.10.0
libtpu: 0.0.40
codegen_flags: <defaults>
</compile_context>

<pallas_src>
import jax
import jax.numpy as jnp
from jax import lax
from jax.experimental import pallas as pl
from jax.experimental.pallas import tpu as pltpu


# ---------------------------------------------------------------------------
# Fused kernel: embedding gather -> GRU recurrence -> NLL reduction.
# ---------------------------------------------------------------------------
def gru_siam_kernel(x_ids_ref, emb_ref, w_ih_ref, w_hh_ref, b_gi_ref, b_hn_ref,
                    y_ref, out_ref, loss_ref, gi_ref):
    T, B, H = out_ref.shape
    V = emb_ref.shape[0]
    TB = T * B

    # --- Embedding gather (fused): one-hot(ids) @ table, table VMEM-resident.
    ids = x_ids_ref[...]                                                # (TB, 1) int32
    onehot_x = (lax.broadcasted_iota(jnp.int32, (TB, V), 1)
                == ids).astype(jnp.float32)                             # (TB, V)
    x_emb = jnp.dot(onehot_x, emb_ref[...],
                    preferred_element_type=jnp.float32)                 # (TB, E)

    # --- Input projections for ALL timesteps in one matmul; biases pre-folded
    #     (b_gi = [b_ih_r + b_hh_r | b_ih_z + b_hh_z | b_ih_n]).
    gi_ref[...] = (jnp.dot(x_emb, w_ih_ref[...],
                           preferred_element_type=jnp.float32)
                   + b_gi_ref[...])                                     # (TB, 3H)

    w_hh = w_hh_ref[...]                                                # (H, 3H), VMEM-resident
    b_hn = b_hn_ref[...]                                                # (1, H)  (b_hh_n, inside r* term)
    iota_h = lax.broadcasted_iota(jnp.int32, (B, H), 1)                 # hoisted once

    h = jnp.zeros((B, H), jnp.float32)                                  # h_0 = 0 (PyTorch default)
    nll_acc = jnp.zeros((1, 1), jnp.float32)

    # Fully static (unrolled) recurrence: only static ref indexing.
    for t in range(T):
        gi = gi_ref[t * B:(t + 1) * B, :]                               # (B, 3H), static slice
        gh = jnp.dot(h, w_hh, preferred_element_type=jnp.float32)       # (B, 3H), single fused matmul
        r = jax.nn.sigmoid(gi[:, 0:H] + gh[:, 0:H])
        z = jax.nn.sigmoid(gi[:, H:2 * H] + gh[:, H:2 * H])
        n = jnp.tanh(gi[:, 2 * H:3 * H] + r * (gh[:, 2 * H:3 * H] + b_hn))
        h = (1.0 - z) * n + z * h
        out_ref[t] = h.astype(out_ref.dtype)

        # Fused NLL contribution of this step: pick out[t, b, y[t, b]].
        onehot_t = (iota_h == y_ref[t]).astype(jnp.float32)             # (B, H)
        nll_acc = nll_acc + jnp.sum(h * onehot_t, axis=(0, 1), keepdims=True)

    loss_ref[...] = -nll_acc * (1.0 / jnp.float32(TB))


def gru_siam_forward(params, x_ids, y):
    emb, w_ih, w_hh, b_ih, b_hh = params
    T, B = x_ids.shape
    H = w_hh.shape[-1]

    # Fuse gate weights along lanes (r|z|n) and pre-fold biases (one-time glue).
    w_ih_f = jnp.concatenate([w_ih[0], w_ih[1], w_ih[2]], axis=1)       # (E, 3H)
    w_hh_f = jnp.concatenate([w_hh[0], w_hh[1], w_hh[2]], axis=1)       # (H, 3H)
    b_gi = jnp.concatenate([b_ih[0] + b_hh[0],
                            b_ih[1] + b_hh[1],
                            b_ih[2]], axis=1)                           # (1, 3H)
    b_hn = b_hh[2]                                                      # (1, H)

    x_ids_2d = x_ids.reshape(T * B, 1).astype(jnp.int32)
    y_3d = y.reshape(T, B, 1).astype(jnp.int32)

    out, loss = pl.pallas_call(
        gru_siam_kernel,
        out_shape=(jax.ShapeDtypeStruct((T, B, H), jnp.float32),
                   jax.ShapeDtypeStruct((1, 1), jnp.float32)),
        in_specs=[pl.BlockSpec(memory_space=pltpu.MemorySpace.VMEM)] * 7,
        out_specs=(pl.BlockSpec(memory_space=pltpu.MemorySpace.VMEM),
                   pl.BlockSpec(memory_space=pltpu.MemorySpace.VMEM)),
        scratch_shapes=[pltpu.VMEM((T * B, 3 * H), jnp.float32)],       # hoisted input projections
    )(x_ids_2d, emb, w_ih_f, w_hh_f, b_gi, b_hn, y_3d)

    h_n = out[-1][None]                                                 # (1, B, H)

    # TODO(synk): the reference F.nll_loss(self.gru(x), y) is applied to the
    # (output, h_n) tuple and is invalid PyTorch; here NLL is applied to the
    # GRU outputs flattened to (T*B, H) (no log_softmax, no tagset projection),
    # mirroring the previous translation.
    return (out, h_n), loss[0, 0]


# ---------------------------------------------------------------------------
# Parameters (deterministic init mimicking nn.Embedding N(0,1) and
# nn.GRU uniform(-1/sqrt(H), 1/sqrt(H))).  Gate order (r, z, n).
# ---------------------------------------------------------------------------
def init_params(key, vocab_size, embedding_dim, hidden_dim):
    k1, k2, k3, k4, k5 = jax.random.split(key, 5)
    emb = jax.random.normal(k1, (vocab_size, embedding_dim), jnp.float32)
    s = 1.0 / float(hidden_dim) ** 0.5
    w_ih = jax.random.uniform(k2, (3, embedding_dim, hidden_dim), jnp.float32, -s, s)
    w_hh = jax.random.uniform(k3, (3, hidden_dim, hidden_dim), jnp.float32, -s, s)
    b_ih = jax.random.uniform(k4, (3, 1, hidden_dim), jnp.float32, -s, s)
    b_hh = jax.random.uniform(k5, (3, 1, hidden_dim), jnp.float32, -s, s)
    return emb, w_ih, w_hh, b_ih, b_hh


# Plain-JAX reference for a correctness sanity check.
def gru_siam_reference(params, x_ids, y):
    emb, w_ih, w_hh, b_ih, b_hh = params
    T, B = x_ids.shape
    H = w_hh.shape[-1]
    x = jnp.take(emb, x_ids, axis=0)                                    # (T, B, E)

    def step(h, x_t):
        gi_r = x_t @ w_ih[0] + b_ih[0]
        gi_z = x_t @ w_ih[1] + b_ih[1]
        gi_n = x_t @ w_ih[2] + b_ih[2]
        gh_r = h @ w_hh[0] + b_hh[0]
        gh_z = h @ w_hh[1] + b_hh[1]
        gh_n = h @ w_hh[2] + b_hh[2]
        r = jax.nn.sigmoid(gi_r + gh_r)
        z = jax.nn.sigmoid(gi_z + gh_z)
        n = jnp.tanh(gi_n + r * gh_n)
        h_new = (1.0 - z) * n + z * h
        return h_new, h_new

    h0 = jnp.zeros((B, H), jnp.float32)
    _, out = lax.scan(step, h0, x)
    logp = out.reshape(-1, H)
    loss = -jnp.mean(logp[jnp.arange(logp.shape[0]), y])
    return out, loss


if __name__ == "__main__":
    vocab_size, embedding_dim, hidden_dim, tagset_size = 50, 16, 32, 10
    T, B = 8, 2

    key = jax.random.PRNGKey(0)
    kp, kx, ky = jax.random.split(key, 3)
    params = init_params(kp, vocab_size, embedding_dim, hidden_dim)

    x_ids = jax.random.randint(kx, (T, B), 0, vocab_size, dtype=jnp.int32)
    y = jax.random.randint(ky, (T * B,), 0, hidden_dim, dtype=jnp.int32)

    (gru_out, h_n), loss = jax.jit(gru_siam_forward)(params, x_ids, y)
    jax.block_until_ready((gru_out, h_n, loss))

    # Sanity check against the plain-JAX reference.
    ref_out, ref_loss = gru_siam_reference(params, x_ids, y)
    assert jnp.allclose(gru_out, ref_out, atol=5e-3, rtol=5e-3)
    assert jnp.allclose(loss, ref_loss, atol=5e-3, rtol=5e-3)

    assert gru_out.shape == (T, B, hidden_dim)
    assert h_n.shape == (1, B, hidden_dim)
    assert loss.shape == ()
    print("KERNEL_OK")
</pallas_src>

<mosaic_0001>
module attributes {stable_mosaic.version = 11 : i64} {
  func.func @gru_siam_kernel(%arg0: memref<16x1xi32, #tpu.memory_space<vmem>>, %arg1: memref<50x16xf32, #tpu.memory_space<vmem>>, %arg2: memref<16x96xf32, #tpu.memory_space<vmem>>, %arg3: memref<32x96xf32, #tpu.memory_space<vmem>>, %arg4: memref<1x96xf32, #tpu.memory_space<vmem>>, %arg5: memref<1x32xf32, #tpu.memory_space<vmem>>, %arg6: memref<8x2x1xi32, #tpu.memory_space<vmem>>, %arg7: memref<8x2x32xf32, #tpu.memory_space<vmem>>, %arg8: memref<1x1xf32, #tpu.memory_space<vmem>>, %arg9: memref<16x96xf32, #tpu.memory_space<vmem>>) attributes {dimension_semantics = [], scalar_prefetch = 0 : i64, scratch_operands = 1 : i64, tpu.core_type = #tpu.core_type<tc>} {
    %c0 = arith.constant 0 : index
    %c0_0 = arith.constant 0 : index
    %0 = vector.load %arg0[%c0, %c0_0] : memref<16x1xi32, #tpu.memory_space<vmem>>, vector<16x1xi32>
    %1 = tpu.iota {dimensions = array<i32: 1>} : vector<16x50xi32>
    %2 = vector.broadcast %0 : vector<16x1xi32> to vector<16x50xi32>
    %3 = arith.cmpi eq, %1, %2 : vector<16x50xi32>
    %4 = arith.extui %3 : vector<16x50xi1> to vector<16x50xi32>
    %5 = arith.sitofp %4 : vector<16x50xi32> to vector<16x50xf32>
    %c0_1 = arith.constant 0 : index
    %c0_2 = arith.constant 0 : index
    %6 = vector.load %arg1[%c0_1, %c0_2] : memref<50x16xf32, #tpu.memory_space<vmem>>, vector<50x16xf32>
    %cst = arith.constant dense<0.000000e+00> : vector<16x16xf32>
    %7 = tpu.matmul %5, %6, %cst {dimension_numbers = #tpu.dot_dimension_numbers<[1], [0], [0], [1], [0, 0, 1, 1], [], []>} : vector<16x50xf32>, vector<50x16xf32>, vector<16x16xf32> -> vector<16x16xf32>
    %c0_3 = arith.constant 0 : index
    %c0_4 = arith.constant 0 : index
    %8 = vector.load %arg2[%c0_3, %c0_4] : memref<16x96xf32, #tpu.memory_space<vmem>>, vector<16x96xf32>
    %cst_5 = arith.constant dense<0.000000e+00> : vector<16x96xf32>
    %9 = tpu.matmul %7, %8, %cst_5 {dimension_numbers = #tpu.dot_dimension_numbers<[1], [0], [0], [1], [0, 0, 1, 1], [], []>} : vector<16x16xf32>, vector<16x96xf32>, vector<16x96xf32> -> vector<16x96xf32>
    %c0_6 = arith.constant 0 : index
    %c0_7 = arith.constant 0 : index
    %10 = vector.load %arg4[%c0_6, %c0_7] : memref<1x96xf32, #tpu.memory_space<vmem>>, vector<1x96xf32>
    %11 = vector.broadcast %10 : vector<1x96xf32> to vector<16x96xf32>
    %12 = arith.addf %9, %11 : vector<16x96xf32>
    %c0_8 = arith.constant 0 : index
    %c0_9 = arith.constant 0 : index
    %13 = vector.load %arg9[%c0_8, %c0_9] : memref<16x96xf32, #tpu.memory_space<vmem>>, vector<16x96xf32>
    tpu.vector_store %arg9[%c0_8, %c0_9], %12 {strides = array<i32>} : memref<16x96xf32, #tpu.memory_space<vmem>>, vector<16x96xf32>,
    %c0_10 = arith.constant 0 : index
    %c0_11 = arith.constant 0 : index
    %14 = vector.load %arg3[%c0_10, %c0_11] : memref<32x96xf32, #tpu.memory_space<vmem>>, vector<32x96xf32>
    %c0_12 = arith.constant 0 : index
    %c0_13 = arith.constant 0 : index
    %15 = vector.load %arg5[%c0_12, %c0_13] : memref<1x32xf32, #tpu.memory_space<vmem>>, vector<1x32xf32>
    %16 = tpu.iota {dimensions = array<i32: 1>} : vector<2x32xi32>
    %cst_14 = arith.constant 0.000000e+00 : f32
    %17 = vector.broadcast %cst_14 : f32 to vector<2x32xf32>
    %cst_15 = arith.constant 0.000000e+00 : f32
    %18 = vector.broadcast %cst_15 : f32 to vector<1x1xf32>
    %c0_16 = arith.constant 0 : index
    %c0_17 = arith.constant 0 : index
    %19 = vector.load %arg9[%c0_16, %c0_17] : memref<16x96xf32, #tpu.memory_space<vmem>>, vector<2x96xf32>
    %cst_18 = arith.constant dense<0.000000e+00> : vector<2x96xf32>
    %20 = tpu.matmul %17, %14, %cst_18 {dimension_numbers = #tpu.dot_dimension_numbers<[1], [0], [0], [1], [0, 0, 1, 1], [], []>} : vector<2x32xf32>, vector<32x96xf32>, vector<2x96xf32> -> vector<2x96xf32>
    %21 = vector.extract_strided_slice %19 {offsets = [0, 0], sizes = [2, 32], strides = [1, 1]} : vector<2x96xf32> to vector<2x32xf32>
    %22 = vector.extract_strided_slice %20 {offsets = [0, 0], sizes = [2, 32], strides = [1, 1]} : vector<2x96xf32> to vector<2x32xf32>
    %23 = arith.addf %21, %22 : vector<2x32xf32>
    %24 = arith.negf %23 : vector<2x32xf32>
    %25 = math.exp %24 : vector<2x32xf32>
    %cst_19 = arith.constant 1.000000e+00 : f32
    %26 = vector.broadcast %cst_19 : f32 to vector<2x32xf32>
    %27 = arith.addf %26, %25 : vector<2x32xf32>
    %28 = arith.divf %26, %27 : vector<2x32xf32>
    %29 = vector.extract_strided_slice %19 {offsets = [0, 32], sizes = [2, 32], strides = [1, 1]} : vector<2x96xf32> to vector<2x32xf32>
    %30 = vector.extract_strided_slice %20 {offsets = [0, 32], sizes = [2, 32], strides = [1, 1]} : vector<2x96xf32> to vector<2x32xf32>
    %31 = arith.addf %29, %30 : vector<2x32xf32>
    %32 = arith.negf %31 : vector<2x32xf32>
    %33 = math.exp %32 : vector<2x32xf32>
    %cst_20 = arith.constant 1.000000e+00 : f32
    %34 = vector.broadcast %cst_20 : f32 to vector<2x32xf32>
    %35 = arith.addf %34, %33 : vector<2x32xf32>
    %36 = arith.divf %34, %35 : vector<2x32xf32>
    %37 = vector.extract_strided_slice %19 {offsets = [0, 64], sizes = [2, 32], strides = [1, 1]} : vector<2x96xf32> to vector<2x32xf32>
    %38 = vector.extract_strided_slice %20 {offsets = [0, 64], sizes = [2, 32], strides = [1, 1]} : vector<2x96xf32> to vector<2x32xf32>
    %39 = vector.broadcast %15 : vector<1x32xf32> to vector<2x32xf32>
    %40 = arith.addf %38, %39 : vector<2x32xf32>
    %41 = arith.mulf %28, %40 : vector<2x32xf32>
    %42 = arith.addf %37, %41 : vector<2x32xf32>
    %43 = math.tanh %42 : vector<2x32xf32>
    %cst_21 = arith.constant 1.000000e+00 : f32
    %44 = vector.broadcast %cst_21 : f32 to vector<2x32xf32>
    %45 = arith.subf %44, %36 : vector<2x32xf32>
    %46 = arith.mulf %45, %43 : vector<2x32xf32>
    %47 = arith.mulf %36, %17 : vector<2x32xf32>
    %48 = arith.addf %46, %47 : vector<2x32xf32>
    %c0_22 = arith.constant 0 : index
    %c0_23 = arith.constant 0 : index
    %c0_24 = arith.constant 0 : index
    %49 = vector.load %arg7[%c0_22, %c0_23, %c0_24] : memref<8x2x32xf32, #tpu.memory_space<vmem>>, vector<1x2x32xf32>
    %50 = vector.shape_cast %49 : vector<1x2x32xf32> to vector<2x32xf32>
    %51 = vector.shape_cast %48 : vector<2x32xf32> to vector<1x2x32xf32>
    tpu.vector_store %arg7[%c0_22, %c0_23, %c0_24], %51 {strides = array<i32>} : memref<8x2x32xf32, #tpu.memory_space<vmem>>, vector<1x2x32xf32>,
    %c0_25 = arith.constant 0 : index
    %c0_26 = arith.constant 0 : index
    %c0_27 = arith.constant 0 : index
    %52 = vector.load %arg6[%c0_25, %c0_26, %c0_27] : memref<8x2x1xi32, #tpu.memory_space<vmem>>, vector<1x2x1xi32>
    %53 = vector.shape_cast %52 : vector<1x2x1xi32> to vector<2x1xi32>
    %54 = vector.broadcast %53 : vector<2x1xi32> to vector<2x32xi32>
    %55 = arith.cmpi eq, %16, %54 : vector<2x32xi32>
    %56 = arith.extui %55 : vector<2x32xi1> to vector<2x32xi32>
    %57 = arith.sitofp %56 : vector<2x32xi32> to vector<2x32xf32>
    %58 = arith.mulf %48, %57 : vector<2x32xf32>
    %59 = vector.shape_cast %58 : vector<2x32xf32> to vector<1x2x32xf32>
    %cst_28 = arith.constant dense<0.000000e+00> : vector<1xf32>
    %60 = vector.multi_reduction <add>, %59, %cst_28 [1, 2] : vector<1x2x32xf32> to vector<1xf32>
    %61 = vector.shape_cast %60 : vector<1xf32> to vector<1x1x1xf32>
    %62 = vector.extract %61[0, 0, 0] : f32 from vector<1x1x1xf32>
    %63 = vector.broadcast %62 : f32 to vector<1x1xf32>
    %64 = arith.addf %18, %63 : vector<1x1xf32>
    %c2 = arith.constant 2 : index
    %c0_29 = arith.constant 0 : index
    %65 = vector.load %arg9[%c2, %c0_29] : memref<16x96xf32, #tpu.memory_space<vmem>>, vector<2x96xf32>
    %cst_30 = arith.constant dense<0.000000e+00> : vector<2x96xf32>
    %66 = tpu.matmul %48, %14, %cst_30 {dimension_numbers = #tpu.dot_dimension_numbers<[1], [0], [0], [1], [0, 0, 1, 1], [], []>} : vector<2x32xf32>, vector<32x96xf32>, vector<2x96xf32> -> vector<2x96xf32>
    %67 = vector.extract_strided_slice %65 {offsets = [0, 0], sizes = [2, 32], strides = [1, 1]} : vector<2x96xf32> to vector<2x32xf32>
    %68 = vector.extract_strided_slice %66 {offsets = [0, 0], sizes = [2, 32], strides = [1, 1]} : vector<2x96xf32> to vector<2x32xf32>
    %69 = arith.addf %67, %68 : vector<2x32xf32>
    %70 = arith.negf %69 : vector<2x32xf32>
    %71 = math.exp %70 : vector<2x32xf32>
    %cst_31 = arith.constant 1.000000e+00 : f32
    %72 = vector.broadcast %cst_31 : f32 to vector<2x32xf32>
    %73 = arith.addf %72, %71 : vector<2x32xf32>
    %74 = arith.divf %72, %73 : vector<2x32xf32>
    %75 = vector.extract_strided_slice %65 {offsets = [0, 32], sizes = [2, 32], strides = [1, 1]} : vector<2x96xf32> to vector<2x32xf32>
    %76 = vector.extract_strided_slice %66 {offsets = [0, 32], sizes = [2, 32], strides = [1, 1]} : vector<2x96xf32> to vector<2x32xf32>
    %77 = arith.addf %75, %76 : vector<2x32xf32>
    %78 = arith.negf %77 : vector<2x32xf32>
    %79 = math.exp %78 : vector<2x32xf32>
    %cst_32 = arith.constant 1.000000e+00 : f32
    %80 = vector.broadcast %cst_32 : f32 to vector<2x32xf32>
    %81 = arith.addf %80, %79 : vector<2x32xf32>
    %82 = arith.divf %80, %81 : vector<2x32xf32>
    %83 = vector.extract_strided_slice %65 {offsets = [0, 64], sizes = [2, 32], strides = [1, 1]} : vector<2x96xf32> to vector<2x32xf32>
    %84 = vector.extract_strided_slice %66 {offsets = [0, 64], sizes = [2, 32], strides = [1, 1]} : vector<2x96xf32> to vector<2x32xf32>
    %85 = vector.broadcast %15 : vector<1x32xf32> to vector<2x32xf32>
    %86 = arith.addf %84, %85 : vector<2x32xf32>
    %87 = arith.mulf %74, %86 : vector<2x32xf32>
    %88 = arith.addf %83, %87 : vector<2x32xf32>
    %89 = math.tanh %88 : vector<2x32xf32>
    %cst_33 = arith.constant 1.000000e+00 : f32
    %90 = vector.broadcast %cst_33 : f32 to vector<2x32xf32>
    %91 = arith.subf %90, %82 : vector<2x32xf32>
    %92 = arith.mulf %91, %89 : vector<2x32xf32>
    %93 = arith.mulf %82, %48 : vector<2x32xf32>
    %94 = arith.addf %92, %93 : vector<2x32xf32>
    %c1 = arith.constant 1 : index
    %c0_34 = arith.constant 0 : index
    %c0_35 = arith.constant 0 : index
    %95 = vector.load %arg7[%c1, %c0_34, %c0_35] : memref<8x2x32xf32, #tpu.memory_space<vmem>>, vector<1x2x32xf32>
    %96 = vector.shape_cast %95 : vector<1x2x32xf32> to vector<2x32xf32>
    %97 = vector.shape_cast %94 : vector<2x32xf32> to vector<1x2x32xf32>
    tpu.vector_store %arg7[%c1, %c0_34, %c0_35], %97 {strides = array<i32>} : memref<8x2x32xf32, #tpu.memory_space<vmem>>, vector<1x2x32xf32>,
    %c1_36 = arith.constant 1 : index
    %c0_37 = arith.constant 0 : index
    %c0_38 = arith.constant 0 : index
    %98 = vector.load %arg6[%c1_36, %c0_37, %c0_38] : memref<8x2x1xi32, #tpu.memory_space<vmem>>, vector<1x2x1xi32>
    %99 = vector.shape_cast %98 : vector<1x2x1xi32> to vector<2x1xi32>
    %100 = vector.broadcast %99 : vector<2x1xi32> to vector<2x32xi32>
    %101 = arith.cmpi eq, %16, %100 : vector<2x32xi32>
    %102 = arith.extui %101 : vector<2x32xi1> to vector<2x32xi32>
    %103 = arith.sitofp %102 : vector<2x32xi32> to vector<2x32xf32>
    %104 = arith.mulf %94, %103 : vector<2x32xf32>
    %105 = vector.shape_cast %104 : vector<2x32xf32> to vector<1x2x32xf32>
    %cst_39 = arith.constant dense<0.000000e+00> : vector<1xf32>
    %106 = vector.multi_reduction <add>, %105, %cst_39 [1, 2] : vector<1x2x32xf32> to vector<1xf32>
    %107 = vector.shape_cast %106 : vector<1xf32> to vector<1x1x1xf32>
    %108 = vector.extract %107[0, 0, 0] : f32 from vector<1x1x1xf32>
    %109 = vector.broadcast %108 : f32 to vector<1x1xf32>
    %110 = arith.addf %64, %109 : vector<1x1xf32>
    %c4 = arith.constant 4 : index
    %c0_40 = arith.constant 0 : index
    %111 = vector.load %arg9[%c4, %c0_40] : memref<16x96xf32, #tpu.memory_space<vmem>>, vector<2x96xf32>
    %cst_41 = arith.constant dense<0.000000e+00> : vector<2x96xf32>
    %112 = tpu.matmul %94, %14, %cst_41 {dimension_numbers = #tpu.dot_dimension_numbers<[1], [0], [0], [1], [0, 0, 1, 1], [], []>} : vector<2x32xf32>, vector<32x96xf32>, vector<2x96xf32> -> vector<2x96xf32>
    %113 = vector.extract_strided_slice %111 {offsets = [0, 0], sizes = [2, 32], strides = [1, 1]} : vector<2x96xf32> to vector<2x32xf32>
    %114 = vector.extract_strided_slice %112 {offsets = [0, 0], sizes = [2, 32], strides = [1, 1]} : vector<2x96xf32> to vector<2x32xf32>
    %115 = arith.addf %113, %114 : vector<2x32xf32>
    %116 = arith.negf %115 : vector<2x32xf32>
    %117 = math.exp %116 : vector<2x32xf32>
    %cst_42 = arith.constant 1.000000e+00 : f32
    %118 = vector.broadcast %cst_42 : f32 to vector<2x32xf32>
    %119 = arith.addf %118, %117 : vector<2x32xf32>
    %120 = arith.divf %118, %119 : vector<2x32xf32>
    %121 = vector.extract_strided_slice %111 {offsets = [0, 32], sizes = [2, 32], strides = [1, 1]} : vector<2x96xf32> to vector<2x32xf32>
    %122 = vector.extract_strided_slice %112 {offsets = [0, 32], sizes = [2, 32], strides = [1, 1]} : vector<2x96xf32> to vector<2x32xf32>
    %123 = arith.addf %121, %122 : vector<2x32xf32>
    %124 = arith.negf %123 : vector<2x32xf32>
    %125 = math.exp %124 : vector<2x32xf32>
    %cst_43 = arith.constant 1.000000e+00 : f32
    %126 = vector.broadcast %cst_43 : f32 to vector<2x32xf32>
    %127 = arith.addf %126, %125 : vector<2x32xf32>
    %128 = arith.divf %126, %127 : vector<2x32xf32>
    %129 = vector.extract_strided_slice %111 {offsets = [0, 64], sizes = [2, 32], strides = [1, 1]} : vector<2x96xf32> to vector<2x32xf32>
    %130 = vector.extract_strided_slice %112 {offsets = [0, 64], sizes = [2, 32], strides = [1, 1]} : vector<2x96xf32> to vector<2x32xf32>
    %131 = vector.broadcast %15 : vector<1x32xf32> to vector<2x32xf32>
    %132 = arith.addf %130, %131 : vector<2x32xf32>
    %133 = arith.mulf %120, %132 : vector<2x32xf32>
    %134 = arith.addf %129, %133 : vector<2x32xf32>
    %135 = math.tanh %134 : vector<2x32xf32>
    %cst_44 = arith.constant 1.000000e+00 : f32
    %136 = vector.broadcast %cst_44 : f32 to vector<2x32xf32>
    %137 = arith.subf %136, %128 : vector<2x32xf32>
    %138 = arith.mulf %137, %135 : vector<2x32xf32>
    %139 = arith.mulf %128, %94 : vector<2x32xf32>
    %140 = arith.addf %138, %139 : vector<2x32xf32>
    %c2_45 = arith.constant 2 : index
    %c0_46 = arith.constant 0 : index
    %c0_47 = arith.constant 0 : index
    %141 = vector.load %arg7[%c2_45, %c0_46, %c0_47] : memref<8x2x32xf32, #tpu.memory_space<vmem>>, vector<1x2x32xf32>
    %142 = vector.shape_cast %141 : vector<1x2x32xf32> to vector<2x32xf32>
    %143 = vector.shape_cast %140 : vector<2x32xf32> to vector<1x2x32xf32>
    tpu.vector_store %arg7[%c2_45, %c0_46, %c0_47], %143 {strides = array<i32>} : memref<8x2x32xf32, #tpu.memory_space<vmem>>, vector<1x2x32xf32>,
    %c2_48 = arith.constant 2 : index
    %c0_49 = arith.constant 0 : index
    %c0_50 = arith.constant 0 : index
    %144 = vector.load %arg6[%c2_48, %c0_49, %c0_50] : memref<8x2x1xi32, #tpu.memory_space<vmem>>, vector<1x2x1xi32>
    %145 = vector.shape_cast %144 : vector<1x2x1xi32> to vector<2x1xi32>
    %146 = vector.broadcast %145 : vector<2x1xi32> to vector<2x32xi32>
    %147 = arith.cmpi eq, %16, %146 : vector<2x32xi32>
    %148 = arith.extui %147 : vector<2x32xi1> to vector<2x32xi32>
    %149 = arith.sitofp %148 : vector<2x32xi32> to vector<2x32xf32>
    %150 = arith.mulf %140, %149 : vector<2x32xf32>
    %151 = vector.shape_cast %150 : vector<2x32xf32> to vector<1x2x32xf32>
    %cst_51 = arith.constant dense<0.000000e+00> : vector<1xf32>
    %152 = vector.multi_reduction <add>, %151, %cst_51 [1, 2] : vector<1x2x32xf32> to vector<1xf32>
    %153 = vector.shape_cast %152 : vector<1xf32> to vector<1x1x1xf32>
    %154 = vector.extract %153[0, 0, 0] : f32 from vector<1x1x1xf32>
    %155 = vector.broadcast %154 : f32 to vector<1x1xf32>
    %156 = arith.addf %110, %155 : vector<1x1xf32>
    %c6 = arith.constant 6 : index
    %c0_52 = arith.constant 0 : index
    %157 = vector.load %arg9[%c6, %c0_52] : memref<16x96xf32, #tpu.memory_space<vmem>>, vector<2x96xf32>
    %cst_53 = arith.constant dense<0.000000e+00> : vector<2x96xf32>
    %158 = tpu.matmul %140, %14, %cst_53 {dimension_numbers = #tpu.dot_dimension_numbers<[1], [0], [0], [1], [0, 0, 1, 1], [], []>} : vector<2x32xf32>, vector<32x96xf32>, vector<2x96xf32> -> vector<2x96xf32>
    %159 = vector.extract_strided_slice %157 {offsets = [0, 0], sizes = [2, 32], strides = [1, 1]} : vector<2x96xf32> to vector<2x32xf32>
    %160 = vector.extract_strided_slice %158 {offsets = [0, 0], sizes = [2, 32], strides = [1, 1]} : vector<2x96xf32> to vector<2x32xf32>
    %161 = arith.addf %159, %160 : vector<2x32xf32>
    %162 = arith.negf %161 : vector<2x32xf32>
    %163 = math.exp %162 : vector<2x32xf32>
    %cst_54 = arith.constant 1.000000e+00 : f32
    %164 = vector.broadcast %cst_54 : f32 to vector<2x32xf32>
    %165 = arith.addf %164, %163 : vector<2x32xf32>
    %166 = arith.divf %164, %165 : vector<2x32xf32>
    %167 = vector.extract_strided_slice %157 {offsets = [0, 32], sizes = [2, 32], strides = [1, 1]} : vector<2x96xf32> to vector<2x32xf32>
    %168 = vector.extract_strided_slice %158 {offsets = [0, 32], sizes = [2, 32], strides = [1, 1]} : vector<2x96xf32> to vector<2x32xf32>
    %169 = arith.addf %167, %168 : vector<2x32xf32>
    %170 = arith.negf %169 : vector<2x32xf32>
    %171 = math.exp %170 : vector<2x32xf32>
    %cst_55 = arith.constant 1.000000e+00 : f32
    %172 = vector.broadcast %cst_55 : f32 to vector<2x32xf32>
    %173 = arith.addf %172, %171 : vector<2x32xf32>
    %174 = arith.divf %172, %173 : vector<2x32xf32>
    %175 = vector.extract_strided_slice %157 {offsets = [0, 64], sizes = [2, 32], strides = [1, 1]} : vector<2x96xf32> to vector<2x32xf32>
    %176 = vector.extract_strided_slice %158 {offsets = [0, 64], sizes = [2, 32], strides = [1, 1]} : vector<2x96xf32> to vector<2x32xf32>
    %177 = vector.broadcast %15 : vector<1x32xf32> to vector<2x32xf32>
    %178 = arith.addf %176, %177 : vector<2x32xf32>
    %179 = arith.mulf %166, %178 : vector<2x32xf32>
    %180 = arith.addf %175, %179 : vector<2x32xf32>
    %181 = math.tanh %180 : vector<2x32xf32>
    %cst_56 = arith.constant 1.000000e+00 : f32
    %182 = vector.broadcast %cst_56 : f32 to vector<2x32xf32>
    %183 = arith.subf %182, %174 : vector<2x32xf32>
    %184 = arith.mulf %183, %181 : vector<2x32xf32>
    %185 = arith.mulf %174, %140 : vector<2x32xf32>
    %186 = arith.addf %184, %185 : vector<2x32xf32>
    %c3 = arith.constant 3 : index
    %c0_57 = arith.constant 0 : index
    %c0_58 = arith.constant 0 : index
    %187 = vector.load %arg7[%c3, %c0_57, %c0_58] : memref<8x2x32xf32, #tpu.memory_space<vmem>>, vector<1x2x32xf32>
    %188 = vector.shape_cast %187 : vector<1x2x32xf32> to vector<2x32xf32>
    %189 = vector.shape_cast %186 : vector<2x32xf32> to vector<1x2x32xf32>
    tpu.vector_store %arg7[%c3, %c0_57, %c0_58], %189 {strides = array<i32>} : memref<8x2x32xf32, #tpu.memory_space<vmem>>, vector<1x2x32xf32>,
    %c3_59 = arith.constant 3 : index
    %c0_60 = arith.constant 0 : index
    %c0_61 = arith.constant 0 : index
    %190 = vector.load %arg6[%c3_59, %c0_60, %c0_61] : memref<8x2x1xi32, #tpu.memory_space<vmem>>, vector<1x2x1xi32>
    %191 = vector.shape_cast %190 : vector<1x2x1xi32> to vector<2x1xi32>
    %192 = vector.broadcast %191 : vector<2x1xi32> to vector<2x32xi32>
    %193 = arith.cmpi eq, %16, %192 : vector<2x32xi32>
    %194 = arith.extui %193 : vector<2x32xi1> to vector<2x32xi32>
    %195 = arith.sitofp %194 : vector<2x32xi32> to vector<2x32xf32>
    %196 = arith.mulf %186, %195 : vector<2x32xf32>
    %197 = vector.shape_cast %196 : vector<2x32xf32> to vector<1x2x32xf32>
    %cst_62 = arith.constant dense<0.000000e+00> : vector<1xf32>
    %198 = vector.multi_reduction <add>, %197, %cst_62 [1, 2] : vector<1x2x32xf32> to vector<1xf32>
    %199 = vector.shape_cast %198 : vector<1xf32> to vector<1x1x1xf32>
    %200 = vector.extract %199[0, 0, 0] : f32 from vector<1x1x1xf32>
    %201 = vector.broadcast %200 : f32 to vector<1x1xf32>
    %202 = arith.addf %156, %201 : vector<1x1xf32>
    %c8 = arith.constant 8 : index
    %c0_63 = arith.constant 0 : index
    %203 = vector.load %arg9[%c8, %c0_63] : memref<16x96xf32, #tpu.memory_space<vmem>>, vector<2x96xf32>
    %cst_64 = arith.constant dense<0.000000e+00> : vector<2x96xf32>
    %204 = tpu.matmul %186, %14, %cst_64 {dimension_numbers = #tpu.dot_dimension_numbers<[1], [0], [0], [1], [0, 0, 1, 1], [], []>} : vector<2x32xf32>, vector<32x96xf32>, vector<2x96xf32> -> vector<2x96xf32>
    %205 = vector.extract_strided_slice %203 {offsets = [0, 0], sizes = [2, 32], strides = [1, 1]} : vector<2x96xf32> to vector<2x32xf32>
    %206 = vector.extract_strided_slice %204 {offsets = [0, 0], sizes = [2, 32], strides = [1, 1]} : vector<2x96xf32> to vector<2x32xf32>
    %207 = arith.addf %205, %206 : vector<2x32xf32>
    %208 = arith.negf %207 : vector<2x32xf32>
    %209 = math.exp %208 : vector<2x32xf32>
    %cst_65 = arith.constant 1.000000e+00 : f32
    %210 = vector.broadcast %cst_65 : f32 to vector<2x32xf32>
    %211 = arith.addf %210, %209 : vector<2x32xf32>
    %212 = arith.divf %210, %211 : vector<2x32xf32>
    %213 = vector.extract_strided_slice %203 {offsets = [0, 32], sizes = [2, 32], strides = [1, 1]} : vector<2x96xf32> to vector<2x32xf32>
    %214 = vector.extract_strided_slice %204 {offsets = [0, 32], sizes = [2, 32], strides = [1, 1]} : vector<2x96xf32> to vector<2x32xf32>
    %215 = arith.addf %213, %214 : vector<2x32xf32>
    %216 = arith.negf %215 : vector<2x32xf32>
    %217 = math.exp %216 : vector<2x32xf32>
    %cst_66 = arith.constant 1.000000e+00 : f32
    %218 = vector.broadcast %cst_66 : f32 to vector<2x32xf32>
    %219 = arith.addf %218, %217 : vector<2x32xf32>
    %220 = arith.divf %218, %219 : vector<2x32xf32>
    %221 = vector.extract_strided_slice %203 {offsets = [0, 64], sizes = [2, 32], strides = [1, 1]} : vector<2x96xf32> to vector<2x32xf32>
    %222 = vector.extract_strided_slice %204 {offsets = [0, 64], sizes = [2, 32], strides = [1, 1]} : vector<2x96xf32> to vector<2x32xf32>
    %223 = vector.broadcast %15 : vector<1x32xf32> to vector<2x32xf32>
    %224 = arith.addf %222, %223 : vector<2x32xf32>
    %225 = arith.mulf %212, %224 : vector<2x32xf32>
    %226 = arith.addf %221, %225 : vector<2x32xf32>
    %227 = math.tanh %226 : vector<2x32xf32>
    %cst_67 = arith.constant 1.000000e+00 : f32
    %228 = vector.broadcast %cst_67 : f32 to vector<2x32xf32>
    %229 = arith.subf %228, %220 : vector<2x32xf32>
    %230 = arith.mulf %229, %227 : vector<2x32xf32>
    %231 = arith.mulf %220, %186 : vector<2x32xf32>
    %232 = arith.addf %230, %231 : vector<2x32xf32>
    %c4_68 = arith.constant 4 : index
    %c0_69 = arith.constant 0 : index
    %c0_70 = arith.constant 0 : index
    %233 = vector.load %arg7[%c4_68, %c0_69, %c0_70] : memref<8x2x32xf32, #tpu.memory_space<vmem>>, vector<1x2x32xf32>
    %234 = vector.shape_cast %233 : vector<1x2x32xf32> to vector<2x32xf32>
    %235 = vector.shape_cast %232 : vector<2x32xf32> to vector<1x2x32xf32>
    tpu.vector_store %arg7[%c4_68, %c0_69, %c0_70], %235 {strides = array<i32>} : memref<8x2x32xf32, #tpu.memory_space<vmem>>, vector<1x2x32xf32>,
    %c4_71 = arith.constant 4 : index
    %c0_72 = arith.constant 0 : index
    %c0_73 = arith.constant 0 : index
    %236 = vector.load %arg6[%c4_71, %c0_72, %c0_73] : memref<8x2x1xi32, #tpu.memory_space<vmem>>, vector<1x2x1xi32>
    %237 = vector.shape_cast %236 : vector<1x2x1xi32> to vector<2x1xi32>
    %238 = vector.broadcast %237 : vector<2x1xi32> to vector<2x32xi32>
    %239 = arith.cmpi eq, %16, %238 : vector<2x32xi32>
    %240 = arith.extui %239 : vector<2x32xi1> to vector<2x32xi32>
    %241 = arith.sitofp %240 : vector<2x32xi32> to vector<2x32xf32>
    %242 = arith.mulf %232, %241 : vector<2x32xf32>
    %243 = vector.shape_cast %242 : vector<2x32xf32> to vector<1x2x32xf32>
    %cst_74 = arith.constant dense<0.000000e+00> : vector<1xf32>
    %244 = vector.multi_reduction <add>, %243, %cst_74 [1, 2] : vector<1x2x32xf32> to vector<1xf32>
    %245 = vector.shape_cast %244 : vector<1xf32> to vector<1x1x1xf32>
    %246 = vector.extract %245[0, 0, 0] : f32 from vector<1x1x1xf32>
    %247 = vector.broadcast %246 : f32 to vector<1x1xf32>
    %248 = arith.addf %202, %247 : vector<1x1xf32>
    %c10 = arith.constant 10 : index
    %c0_75 = arith.constant 0 : index
    %249 = vector.load %arg9[%c10, %c0_75] : memref<16x96xf32, #tpu.memory_space<vmem>>, vector<2x96xf32>
    %cst_76 = arith.constant dense<0.000000e+00> : vector<2x96xf32>
    %250 = tpu.matmul %232, %14, %cst_76 {dimension_numbers = #tpu.dot_dimension_numbers<[1], [0], [0], [1], [0, 0, 1, 1], [], []>} : vector<2x32xf32>, vector<32x96xf32>, vector<2x96xf32> -> vector<2x96xf32>
    %251 = vector.extract_strided_slice %249 {offsets = [0, 0], sizes = [2, 32], strides = [1, 1]} : vector<2x96xf32> to vector<2x32xf32>
    %252 = vector.extract_strided_slice %250 {offsets = [0, 0], sizes = [2, 32], strides = [1, 1]} : vector<2x96xf32> to vector<2x32xf32>
    %253 = arith.addf %251, %252 : vector<2x32xf32>
    %254 = arith.negf %253 : vector<2x32xf32>
    %255 = math.exp %254 : vector<2x32xf32>
    %cst_77 = arith.constant 1.000000e+00 : f32
    %256 = vector.broadcast %cst_77 : f32 to vector<2x32xf32>
    %257 = arith.addf %256, %255 : vector<2x32xf32>
    %258 = arith.divf %256, %257 : vector<2x32xf32>
    %259 = vector.extract_strided_slice %249 {offsets = [0, 32], sizes = [2, 32], strides = [1, 1]} : vector<2x96xf32> to vector<2x32xf32>
    %260 = vector.extract_strided_slice %250 {offsets = [0, 32], sizes = [2, 32], strides = [1, 1]} : vector<2x96xf32> to vector<2x32xf32>
    %261 = arith.addf %259, %260 : vector<2x32xf32>
    %262 = arith.negf %261 : vector<2x32xf32>
    %263 = math.exp %262 : vector<2x32xf32>
    %cst_78 = arith.constant 1.000000e+00 : f32
    %264 = vector.broadcast %cst_78 : f32 to vector<2x32xf32>
    %265 = arith.addf %264, %263 : vector<2x32xf32>
    %266 = arith.divf %264, %265 : vector<2x32xf32>
    %267 = vector.extract_strided_slice %249 {offsets = [0, 64], sizes = [2, 32], strides = [1, 1]} : vector<2x96xf32> to vector<2x32xf32>
    %268 = vector.extract_strided_slice %250 {offsets = [0, 64], sizes = [2, 32], strides = [1, 1]} : vector<2x96xf32> to vector<2x32xf32>
    %269 = vector.broadcast %15 : vector<1x32xf32> to vector<2x32xf32>
    %270 = arith.addf %268, %269 : vector<2x32xf32>
    %271 = arith.mulf %258, %270 : vector<2x32xf32>
    %272 = arith.addf %267, %271 : vector<2x32xf32>
    %273 = math.tanh %272 : vector<2x32xf32>
    %cst_79 = arith.constant 1.000000e+00 : f32
    %274 = vector.broadcast %cst_79 : f32 to vector<2x32xf32>
    %275 = arith.subf %274, %266 : vector<2x32xf32>
    %276 = arith.mulf %275, %273 : vector<2x32xf32>
    %277 = arith.mulf %266, %232 : vector<2x32xf32>
    %278 = arith.addf %276, %277 : vector<2x32xf32>
    %c5 = arith.constant 5 : index
    %c0_80 = arith.constant 0 : index
    %c0_81 = arith.constant 0 : index
    %279 = vector.load %arg7[%c5, %c0_80, %c0_81] : memref<8x2x32xf32, #tpu.memory_space<vmem>>, vector<1x2x32xf32>
    %280 = vector.shape_cast %279 : vector<1x2x32xf32> to vector<2x32xf32>
    %281 = vector.shape_cast %278 : vector<2x32xf32> to vector<1x2x32xf32>
    tpu.vector_store %arg7[%c5, %c0_80, %c0_81], %281 {strides = array<i32>} : memref<8x2x32xf32, #tpu.memory_space<vmem>>, vector<1x2x32xf32>,
    %c5_82 = arith.constant 5 : index
    %c0_83 = arith.constant 0 : index
    %c0_84 = arith.constant 0 : index
    %282 = vector.load %arg6[%c5_82, %c0_83, %c0_84] : memref<8x2x1xi32, #tpu.memory_space<vmem>>, vector<1x2x1xi32>
    %283 = vector.shape_cast %282 : vector<1x2x1xi32> to vector<2x1xi32>
    %284 = vector.broadcast %283 : vector<2x1xi32> to vector<2x32xi32>
    %285 = arith.cmpi eq, %16, %284 : vector<2x32xi32>
    %286 = arith.extui %285 : vector<2x32xi1> to vector<2x32xi32>
    %287 = arith.sitofp %286 : vector<2x32xi32> to vector<2x32xf32>
    %288 = arith.mulf %278, %287 : vector<2x32xf32>
    %289 = vector.shape_cast %288 : vector<2x32xf32> to vector<1x2x32xf32>
    %cst_85 = arith.constant dense<0.000000e+00> : vector<1xf32>
    %290 = vector.multi_reduction <add>, %289, %cst_85 [1, 2] : vector<1x2x32xf32> to vector<1xf32>
    %291 = vector.shape_cast %290 : vector<1xf32> to vector<1x1x1xf32>
    %292 = vector.extract %291[0, 0, 0] : f32 from vector<1x1x1xf32>
    %293 = vector.broadcast %292 : f32 to vector<1x1xf32>
    %294 = arith.addf %248, %293 : vector<1x1xf32>
    %c12 = arith.constant 12 : index
    %c0_86 = arith.constant 0 : index
    %295 = vector.load %arg9[%c12, %c0_86] : memref<16x96xf32, #tpu.memory_space<vmem>>, vector<2x96xf32>
    %cst_87 = arith.constant dense<0.000000e+00> : vector<2x96xf32>
    %296 = tpu.matmul %278, %14, %cst_87 {dimension_numbers = #tpu.dot_dimension_numbers<[1], [0], [0], [1], [0, 0, 1, 1], [], []>} : vector<2x32xf32>, vector<32x96xf32>, vector<2x96xf32> -> vector<2x96xf32>
    %297 = vector.extract_strided_slice %295 {offsets = [0, 0], sizes = [2, 32], strides = [1, 1]} : vector<2x96xf32> to vector<2x32xf32>
    %298 = vector.extract_strided_slice %296 {offsets = [0, 0], sizes = [2, 32], strides = [1, 1]} : vector<2x96xf32> to vector<2x32xf32>
    %299 = arith.addf %297, %298 : vector<2x32xf32>
    %300 = arith.negf %299 : vector<2x32xf32>
    %301 = math.exp %300 : vector<2x32xf32>
    %cst_88 = arith.constant 1.000000e+00 : f32
    %302 = vector.broadcast %cst_88 : f32 to vector<2x32xf32>
    %303 = arith.addf %302, %301 : vector<2x32xf32>
    %304 = arith.divf %302, %303 : vector<2x32xf32>
    %305 = vector.extract_strided_slice %295 {offsets = [0, 32], sizes = [2, 32], strides = [1, 1]} : vector<2x96xf32> to vector<2x32xf32>
    %306 = vector.extract_strided_slice %296 {offsets = [0, 32], sizes = [2, 32], strides = [1, 1]} : vector<2x96xf32> to vector<2x32xf32>
    %307 = arith.addf %305, %306 : vector<2x32xf32>
    %308 = arith.negf %307 : vector<2x32xf32>
    %309 = math.exp %308 : vector<2x32xf32>
    %cst_89 = arith.constant 1.000000e+00 : f32
    %310 = vector.broadcast %cst_89 : f32 to vector<2x32xf32>
    %311 = arith.addf %310, %309 : vector<2x32xf32>
    %312 = arith.divf %310, %311 : vector<2x32xf32>
    %313 = vector.extract_strided_slice %295 {offsets = [0, 64], sizes = [2, 32], strides = [1, 1]} : vector<2x96xf32> to vector<2x32xf32>
    %314 = vector.extract_strided_slice %296 {offsets = [0, 64], sizes = [2, 32], strides = [1, 1]} : vector<2x96xf32> to vector<2x32xf32>
    %315 = vector.broadcast %15 : vector<1x32xf32> to vector<2x32xf32>
    %316 = arith.addf %314, %315 : vector<2x32xf32>
    %317 = arith.mulf %304, %316 : vector<2x32xf32>
    %318 = arith.addf %313, %317 : vector<2x32xf32>
    %319 = math.tanh %318 : vector<2x32xf32>
    %cst_90 = arith.constant 1.000000e+00 : f32
    %320 = vector.broadcast %cst_90 : f32 to vector<2x32xf32>
    %321 = arith.subf %320, %312 : vector<2x32xf32>
    %322 = arith.mulf %321, %319 : vector<2x32xf32>
    %323 = arith.mulf %312, %278 : vector<2x32xf32>
    %324 = arith.addf %322, %323 : vector<2x32xf32>
    %c6_91 = arith.constant 6 : index
    %c0_92 = arith.constant 0 : index
    %c0_93 = arith.constant 0 : index
    %325 = vector.load %arg7[%c6_91, %c0_92, %c0_93] : memref<8x2x32xf32, #tpu.memory_space<vmem>>, vector<1x2x32xf32>
    %326 = vector.shape_cast %325 : vector<1x2x32xf32> to vector<2x32xf32>
    %327 = vector.shape_cast %324 : vector<2x32xf32> to vector<1x2x32xf32>
    tpu.vector_store %arg7[%c6_91, %c0_92, %c0_93], %327 {strides = array<i32>} : memref<8x2x32xf32, #tpu.memory_space<vmem>>, vector<1x2x32xf32>,
    %c6_94 = arith.constant 6 : index
    %c0_95 = arith.constant 0 : index
    %c0_96 = arith.constant 0 : index
    %328 = vector.load %arg6[%c6_94, %c0_95, %c0_96] : memref<8x2x1xi32, #tpu.memory_space<vmem>>, vector<1x2x1xi32>
    %329 = vector.shape_cast %328 : vector<1x2x1xi32> to vector<2x1xi32>
    %330 = vector.broadcast %329 : vector<2x1xi32> to vector<2x32xi32>
    %331 = arith.cmpi eq, %16, %330 : vector<2x32xi32>
    %332 = arith.extui %331 : vector<2x32xi1> to vector<2x32xi32>
    %333 = arith.sitofp %332 : vector<2x32xi32> to vector<2x32xf32>
    %334 = arith.mulf %324, %333 : vector<2x32xf32>
    %335 = vector.shape_cast %334 : vector<2x32xf32> to vector<1x2x32xf32>
    %cst_97 = arith.constant dense<0.000000e+00> : vector<1xf32>
    %336 = vector.multi_reduction <add>, %335, %cst_97 [1, 2] : vector<1x2x32xf32> to vector<1xf32>
    %337 = vector.shape_cast %336 : vector<1xf32> to vector<1x1x1xf32>
    %338 = vector.extract %337[0, 0, 0] : f32 from vector<1x1x1xf32>
    %339 = vector.broadcast %338 : f32 to vector<1x1xf32>
    %340 = arith.addf %294, %339 : vector<1x1xf32>
    %c14 = arith.constant 14 : index
    %c0_98 = arith.constant 0 : index
    %341 = vector.load %arg9[%c14, %c0_98] : memref<16x96xf32, #tpu.memory_space<vmem>>, vector<2x96xf32>
    %cst_99 = arith.constant dense<0.000000e+00> : vector<2x96xf32>
    %342 = tpu.matmul %324, %14, %cst_99 {dimension_numbers = #tpu.dot_dimension_numbers<[1], [0], [0], [1], [0, 0, 1, 1], [], []>} : vector<2x32xf32>, vector<32x96xf32>, vector<2x96xf32> -> vector<2x96xf32>
    %343 = vector.extract_strided_slice %341 {offsets = [0, 0], sizes = [2, 32], strides = [1, 1]} : vector<2x96xf32> to vector<2x32xf32>
    %344 = vector.extract_strided_slice %342 {offsets = [0, 0], sizes = [2, 32], strides = [1, 1]} : vector<2x96xf32> to vector<2x32xf32>
    %345 = arith.addf %343, %344 : vector<2x32xf32>
    %346 = arith.negf %345 : vector<2x32xf32>
    %347 = math.exp %346 : vector<2x32xf32>
    %cst_100 = arith.constant 1.000000e+00 : f32
    %348 = vector.broadcast %cst_100 : f32 to vector<2x32xf32>
    %349 = arith.addf %348, %347 : vector<2x32xf32>
    %350 = arith.divf %348, %349 : vector<2x32xf32>
    %351 = vector.extract_strided_slice %341 {offsets = [0, 32], sizes = [2, 32], strides = [1, 1]} : vector<2x96xf32> to vector<2x32xf32>
    %352 = vector.extract_strided_slice %342 {offsets = [0, 32], sizes = [2, 32], strides = [1, 1]} : vector<2x96xf32> to vector<2x32xf32>
    %353 = arith.addf %351, %352 : vector<2x32xf32>
    %354 = arith.negf %353 : vector<2x32xf32>
    %355 = math.exp %354 : vector<2x32xf32>
    %cst_101 = arith.constant 1.000000e+00 : f32
    %356 = vector.broadcast %cst_101 : f32 to vector<2x32xf32>
    %357 = arith.addf %356, %355 : vector<2x32xf32>
    %358 = arith.divf %356, %357 : vector<2x32xf32>
    %359 = vector.extract_strided_slice %341 {offsets = [0, 64], sizes = [2, 32], strides = [1, 1]} : vector<2x96xf32> to vector<2x32xf32>
    %360 = vector.extract_strided_slice %342 {offsets = [0, 64], sizes = [2, 32], strides = [1, 1]} : vector<2x96xf32> to vector<2x32xf32>
    %361 = vector.broadcast %15 : vector<1x32xf32> to vector<2x32xf32>
    %362 = arith.addf %360, %361 : vector<2x32xf32>
    %363 = arith.mulf %350, %362 : vector<2x32xf32>
    %364 = arith.addf %359, %363 : vector<2x32xf32>
    %365 = math.tanh %364 : vector<2x32xf32>
    %cst_102 = arith.constant 1.000000e+00 : f32
    %366 = vector.broadcast %cst_102 : f32 to vector<2x32xf32>
    %367 = arith.subf %366, %358 : vector<2x32xf32>
    %368 = arith.mulf %367, %365 : vector<2x32xf32>
    %369 = arith.mulf %358, %324 : vector<2x32xf32>
    %370 = arith.addf %368, %369 : vector<2x32xf32>
    %c7 = arith.constant 7 : index
    %c0_103 = arith.constant 0 : index
    %c0_104 = arith.constant 0 : index
    %371 = vector.load %arg7[%c7, %c0_103, %c0_104] : memref<8x2x32xf32, #tpu.memory_space<vmem>>, vector<1x2x32xf32>
    %372 = vector.shape_cast %371 : vector<1x2x32xf32> to vector<2x32xf32>
    %373 = vector.shape_cast %370 : vector<2x32xf32> to vector<1x2x32xf32>
    tpu.vector_store %arg7[%c7, %c0_103, %c0_104], %373 {strides = array<i32>} : memref<8x2x32xf32, #tpu.memory_space<vmem>>, vector<1x2x32xf32>,
    %c7_105 = arith.constant 7 : index
    %c0_106 = arith.constant 0 : index
    %c0_107 = arith.constant 0 : index
    %374 = vector.load %arg6[%c7_105, %c0_106, %c0_107] : memref<8x2x1xi32, #tpu.memory_space<vmem>>, vector<1x2x1xi32>
    %375 = vector.shape_cast %374 : vector<1x2x1xi32> to vector<2x1xi32>
    %376 = vector.broadcast %375 : vector<2x1xi32> to vector<2x32xi32>
    %377 = arith.cmpi eq, %16, %376 : vector<2x32xi32>
    %378 = arith.extui %377 : vector<2x32xi1> to vector<2x32xi32>
    %379 = arith.sitofp %378 : vector<2x32xi32> to vector<2x32xf32>
    %380 = arith.mulf %370, %379 : vector<2x32xf32>
    %381 = vector.shape_cast %380 : vector<2x32xf32> to vector<1x2x32xf32>
    %cst_108 = arith.constant dense<0.000000e+00> : vector<1xf32>
    %382 = vector.multi_reduction <add>, %381, %cst_108 [1, 2] : vector<1x2x32xf32> to vector<1xf32>
    %383 = vector.shape_cast %382 : vector<1xf32> to vector<1x1x1xf32>
    %384 = vector.extract %383[0, 0, 0] : f32 from vector<1x1x1xf32>
    %385 = vector.broadcast %384 : f32 to vector<1x1xf32>
    %386 = arith.addf %340, %385 : vector<1x1xf32>
    %cst_109 = arith.constant 0.000000e+00 : f32
    %387 = vector.broadcast %cst_109 : f32 to vector<1x1xf32>
    %388 = arith.subf %387, %386 : vector<1x1xf32>
    %cst_110 = arith.constant 1.000000e+00 : f32
    %cst_111 = arith.constant 1.600000e+01 : f32
    %389 = arith.divf %cst_110, %cst_111 : f32
    %390 = vector.broadcast %389 : f32 to vector<1x1xf32>
    %391 = arith.mulf %388, %390 : vector<1x1xf32>
    %c0_112 = arith.constant 0 : index
    %c0_113 = arith.constant 0 : index
    %392 = vector.load %arg8[%c0_112, %c0_113] : memref<1x1xf32, #tpu.memory_space<vmem>>, vector<1x1xf32>
    tpu.vector_store %arg8[%c0_112, %c0_113], %391 {strides = array<i32>} : memref<1x1xf32, #tpu.memory_space<vmem>>, vector<1x1xf32>,
    return
  }
}

</mosaic_0001>

<bundles_post_ra>
// kernel: gru_siam_forward.1
= control target key start
LH: loop header
LB: loop body
LE: loop exit
PB: predicated region body
PF: predicated region fallthrough
CT: control target
= control target key end

     0   :  { %v1736_v2 = vmov 0   ;;  %s2094_s0 = inlined_call_operand.vmem [shape: s32[16,1], index: 0, kind: input, shape index: {}]   ;;  %s2095_s1 = inlined_call_operand.vmem [shape: f32[50,16], index: 1, kind: input, shape index: {}]   ;;  %s2096_s2 = inlined_call_operand.vmem [shape: f32[16,96], index: 2, kind: input, shape index: {}]   ;;  %s2097_s3 = inlined_call_operand.vmem [shape: f32[32,96], index: 3, kind: input, shape index: {}]   ;;  %s2098_s4 = inlined_call_operand.vmem [shape: f32[1,96], index: 4, kind: input, shape index: {}]   ;;  %s2099_s5 = inlined_call_operand.vmem [shape: f32[1,32], index: 5, kind: input, shape index: {}]   ;;  %s2100_s6 = inlined_call_operand.vmem [shape: s32[8,2,1], index: 6, kind: input, shape index: {}]   ;;  %s2101_s7 = inlined_call_operand.vmem [shape: f32[8,2,32], index: 7, kind: output, shape index: {0}]   ;;  %s2102_s8 = inlined_call_operand.hbm [shape: f32[1,1], index: 8, kind: output, shape index: {1}]  }
   0x1   :  { %v29_v0 = vld [vmem:[%s2094_s0] sm:$0xff]  ;;  %1647 = vset.pattern.permute.xlu0 %v1736_v2  ;;  %v46_v3 = vld [vmem:[%s2095_s1 + $0x8] sm:$0xff]  ;;  %v47_v4 = vld [vmem:[%s2095_s1 + $0x10] sm:$0xff]  ;;  %1648 = vset.pattern.permute.xlu1 %v1736_v2 }
   0x2   :  { %v45_v1 = vld [vmem:[%s2095_s1] sm:$0xff]  ;;  %v48_v5 = vld [vmem:[%s2095_s1 + $0x18] sm:$0xff]  ;;  %34 = vperm.xlu0 %1647, %v29_v0  }
   0x3   :  { %v1559_v6 = vpack.c.bf16 %v46_v3, %v45_v1  ;;  %v1563_v7 = vpack.c.bf16 %v48_v5, %v47_v4 }
   0x4   :  { %14 = vsyncpa [#allocation4], 0  ;;  %v30_v8 = vld [vmem:[%s2094_s0 + $0x8] sm:$0xff]  ;;  %v49_v9 = vld [vmem:[%s2095_s1 + $0x20] sm:$0xff]  ;;  %v1737_v15 = vmov 0.0|0.0   ;;  %vm1738_vm0 = vmmov 0   ;;  %v31_v24 = vlaneseq }
   0x5   :  { %v50_v10 = vld [vmem:[%s2095_s1 + $0x28] sm:$0xff]  ;;  %1560 = vmatprep.subr.bf16.mxu0 %v1559_v6  ;;  %v232_v12 = vld [vmem:[%s2097_s3] sm:$0xff]  ;;  %v234_v14 = vld [vmem:[%s2097_s3 + $0x10] sm:$0xff]  ;;  %1575 = vmatprep.subr.bf16.mxu1 %v1737_v15  ;;  %v1739_v18 = vmov 0.0   ;;  %vm59_vm1 = vcmask 1041408   ;;  %vm52_vm2 = vcmask 408576  }
   0x6   :  { %1562 = vmatpush3.bf16.msra.mxu0 %v1559_v6  ;;  %37 = vperm.xlu0 %1647, %v30_v8   ;;  %v1567_v11 = vpack.c.bf16 %v50_v10, %v49_v9  ;;  %v233_v13 = vld [vmem:[%s2097_s3 + $0x8] sm:$0xff]  ;;  %v235_v17 = vld [vmem:[%s2097_s3 + $0x18] sm:$0xff]  ;;  %v51_v19 = vld [vmem:[%s2095_s1 + $0x30] sm:$0x3]  ;;  %v1852_v25 = vand.u32 127, %v31_v24  ;;  %s1740_s11 = smov 64  }
   0x7   :  { %1564 = vmatprep.subr.bf16.mxu0 %v1563_v7  ;;  %v1823_v16 = vpack.c.bf16 %v233_v13, %v232_v12  ;;  %1479 = vmatprep.mubr.msk.f32.mxu1 %vm1738_vm0, %v1739_v18  ;;  %v1834_v20 = vpack.c.bf16 %v235_v17, %v234_v14  ;;  %v138_v21 = vld [vmem:[%s2096_s2] sm:$0xff]  ;;  %v139_v22 = vld [vmem:[%s2096_s2 + $0x8] sm:$0xff]  ;;  %vm147_vm5 = vcmask 130048   ;;  %vm229_vm6 = vcmask 785408   ;;  %s1743_s24 = smov [#allocation3]  }
   0x8   :  { %v1571_v23 = vpack.c.bf16 %v139_v22, %v138_v21  ;;  %v1357_v30 = vld [vmem:[%s2099_s5] ss:$0 sm:$0xff]  ;;  %vm351_vm7 = vcmask 254976   ;;  %vm238_vm8 = vcmask 261120   ;;  %s1338_s0 = sshll.u32 %s1743_s24, 4  ;;  %s1339_s0 = int_to_ptr.vmem [resolvable:$true] %s1338_s0 }
   0x9   :  { %1577 = vmatpush3.bf16.msra.mxu1 %v1823_v16  ;;  %324 = vrot.lane.b32.xlu1 %v1357_v30, %s1740_s11  ;;  %v1353_v37 = vld [vmem:[%s2098_s4] ss:$0 sm:$0xff]  ;;  %s1741_s4 = smov 96   ;;  %s1712_s25 = scalar_lea.vmem %s1339_s0, 16 }
   0xa   :  { %1566 = vmatpush3.bf16.msra.mxu0 %v1563_v7  ;;  %1578 = vmatprep.subr.bf16.mxu1 %v1737_v15  ;;  %p1713_p0 = scmp.ne.s32.totalorder %s1339_s0, %s1712_s25  ;;  %s1716_s26 = scalar_lea.vmem %s1339_s0, 32 }
   0xb   :  { %1568 = vmatprep.subr.bf16.mxu0 %v1567_v11  ;;  %p1717_p1 = scmp.lt.s32.totalorder %s1339_s0, %s1339_s0  ;;  %p1718_p2 = scmp.lt.s32.totalorder %s1716_s26, %s1712_s25 }
   0xd   :  { %1580 = vmatpush3.bf16.msra.mxu1 %v1834_v20  ;;  %p1719_p3 = por %p1718_p2, %p1717_p1 }
   0xe   :  { %1570 = vmatpush3.bf16.msra.mxu0 %v1567_v11  ;;  %1581 = vmatprep.subr.bf16.mxu1 %v1737_v15 }
   0xf   :  { %1459 = vmatprep.subr.msk.mxu0 %vm59_vm1, %v51_v19  ;;  %p1720_p4 = pnand %p1719_p3, %p1713_p0 }
  0x10   :  { %1480 = vmatmul.mubr.f32.vlgmr.msra.gmra.mrb[0].mxu1 %v1739_v18 }
  0x11   :  { %1583 = vmatpush3.bf16.msra.mxu1 %v1823_v16  ;;  %1490 = vmatprep.mubr.msk.f32.mxu1 %vm1738_vm0, %v1739_v18 }
  0x12   :  { %1460 = vmatpush3.msk.msra.mxu0 %vm59_vm1, %v51_v19  ;;  %1584 = vmatprep.subr.bf16.mxu1 %v1737_v15  ;;  %vm1328_vm1 = vcmask 0  }
  0x13   :  { %1572 = vmatprep.subr.bf16.mxu0 %v1571_v23 }
  0x15   :  { %1586 = vmatpush3.bf16.msra.mxu1 %v1834_v20 }
  0x16   :  { %1593 = vmatprep.subr.bf16.mxu1 %v1737_v15 }
  0x7b   :  { %v1863_v33 = vpop.permute.xlu1 %324 }
  0x81   :  { %v35_v26 = vpop.permute.xlu0 %34 }
  0x82   :  { %vm39_vm3 = vcmp.eq.s32.totalorder %v1852_v25, %v35_v26 }
  0x83   :  { %v1348_v27 = vsel %vm39_vm3, 1.0, %v1739_v18 }
  0x84   :  { %1461 = vmatprep.mubr.msk.f32.mxu0 %vm52_vm2, %v1348_v27 }
  0x85   :  { %v38_v28 = vpop.permute.xlu0 %37 }
  0x86   :  { %vm40_vm4 = vcmp.eq.s32.totalorder %v1852_v25, %v38_v28 }
  0x87   :  { %v1349_v29 = vsel %vm40_vm4, 1.0, %v1739_v18 }
  0x88   :  { %1462 = vmatmul.mubr.msk.f32.vlgmr.msra.gmra.mrb[0].mxu0 %vm52_vm2, %v1349_v29 }
  0x89   :  { %1574 = vmatpush3.bf16.msra.mxu0 %v1571_v23 }
  0x8a   :  { %1587 = vmatprep.subr.bf16.mxu0 %v1737_v15 }
  0xe3   :  { %v308_v31 = vpop.f32.mrb[0].mxu1 }
  0xe4   :  { %v1481_v32 = vpop.f32.mrb[1].mxu1  ;;  %v327_v34 = vadd.f32 %v1863_v33, %v308_v31 }
  0xe6   :  { %329 = vrot.lane.b32.xlu1 %v327_v34, %s1740_s11 }
 0x158   :  { %v330_v47 = vpop.permute.xlu1 %329 }
 0x15b   :  { %v1463_v35 = vpop.f32.mrb[0].mxu0 }
 0x15c   :  { %v129_v36 = vpop.f32.mrb[1].mxu0 }
 0x15d   :  { %1468 = vmatprep.mubr.msk.f32.mxu0 %vm147_vm5, %v129_v36 }
 0x15e   :  { %1469 = vmatmul.mubr.msk.f32.vlgmr.msra.gmra.mrb[2].mxu0 %vm147_vm5, %v1463_v35 }
 0x15f   :  { %1589 = vmatpush3.bf16.msra.mxu0 %v1823_v16  ;;  %1501 = vmatprep.mubr.msk.f32.mxu0 %vm1738_vm0, %v1739_v18 }
 0x160   :  { %1590 = vmatprep.subr.bf16.mxu0 %v1737_v15 }
 0x163   :  { %1592 = vmatpush3.bf16.msra.mxu0 %v1834_v20 }
 0x164   :  { %1599 = vmatprep.subr.bf16.mxu0 %v1737_v15 }
 0x231   :  { %v1470_v38 = vpop.f32.mrb[2].mxu0 }
 0x232   :  { %v226_v39 = vadd.f32 %v1470_v38, %v1353_v37  ;;  %v220_v40 = vpop.f32.mrb[3].mxu0 }
 0x233   :  { %v221_v41 = vadd.f32 %v1353_v37, %v220_v40 }
 0x234   :  { %231 = vst.msk [vmem:[#allocation2 + $0x8] sm:$0xff] %vm229_vm6, %v226_v39 }
 0x235   :  { %230 = vst.msk [vmem:[#allocation2] sm:$0xff] %vm229_vm6, %v221_v41 }
 0x23c   :  { %v237_v42 = vld [vmem:[#allocation2] sm:$0x3]  ;;  %v381_v62 = vld [vmem:[#allocation2 + $0x2] sm:$0x3]  ;;  %v516_v22 = vld [vmem:[#allocation2 + $0x4] sm:$0x3] }
 0x23d   :  { %v312_v43 = vadd.f32 %v308_v31, %v237_v42 }
 0x23f   :  { %v1356_v44 = vmul.f32 -1.442695, %v312_v43 }
 0x241   :  { %1664 = vpow2.f32 %v1356_v44  ;;  %v651_v44 = vld [vmem:[#allocation2 + $0x6] sm:$0x3] }
 0x24b   :  { %v1665_v45 = vpop.eup %1664 }
 0x24c   :  { %v316_v46 = vadd.f32 1.0, %v1665_v45 }
 0x24e   :  { %1666 = vrcp.f32 %v316_v46 }
 0x258   :  { %v1667_v48 = vpop.eup %1666 }
 0x259   :  { %v332_v49 = vmul.f32 %v1667_v48, %v330_v47  ;;  %v339_v53 = vsub.f32 1.0, %v1667_v48  ;;  %v345_v55 = vmul.f32 0.0, %v1667_v48 }
 0x25b   :  { %334 = vrot.lane.b32.xlu0 %v332_v49, %s1740_s11 }
 0x2cd   :  { %v335_v50 = vpop.permute.xlu0 %334 }
 0x2ce   :  { %v337_v51 = vadd.f32 %v335_v50, %v237_v42 }
 0x2d0   :  { %1668 = vtanh.f32 %v337_v51 }
 0x2da   :  { %v1669_v52 = vpop.eup %1668 }
 0x2db   :  { %341 = vrot.lane.b32.xlu1 %v1669_v52, %s1741_s4 }
 0x34d   :  { %v342_v54 = vpop.permute.xlu1 %341 }
 0x34e   :  { %v344_v56 = vmul.f32 %v342_v54, %v339_v53 }
 0x350   :  { %v1878_v57 = vadd.f32 %v345_v55, %v344_v56 }
 0x352   :  { %348 = vrot.lane.b32.xlu0 %v1878_v57, %s1741_s4 }
 0x3c4   :  { %v349_v58 = vpop.permute.xlu0 %348 }
 0x3c5   :  { %352 = vst.msk [vmem:[%s2101_s7] sm:$0x3] %vm351_vm7, %v349_v58  ;;  %1491 = vmatmul.mubr.msk.f32.vlgmr.msra.gmra.mrb[2].mxu1 %vm238_vm8, %v349_v58 }
 0x3c6   :  { %1595 = vmatpush3.bf16.msra.mxu1 %v1823_v16  ;;  %1512 = vmatprep.mubr.msk.f32.mxu1 %vm1738_vm0, %v1739_v18 }
 0x3c7   :  { %1596 = vmatprep.subr.bf16.mxu1 %v1737_v15 }
 0x3ca   :  { %1598 = vmatpush3.bf16.msra.mxu1 %v1834_v20 }
 0x3cb   :  { %1605 = vmatprep.subr.bf16.mxu1 %v1737_v15 }
 0x498   :  { %v450_v59 = vpop.f32.mrb[2].mxu1 }
 0x499   :  { %v461_v60 = vadd.f32 %v450_v59, %v1863_v33  ;;  %v1492_v61 = vpop.f32.mrb[3].mxu1  ;;  %v454_v63 = vadd.f32 %v450_v59, %v381_v62 }
 0x49b   :  { %463 = vrot.lane.b32.xlu1 %v461_v60, %s1740_s11  ;;  %v1360_v0 = vmul.f32 -1.442695, %v454_v63 }
 0x49d   :  { %1670 = vpow2.f32 %v1360_v0 }
 0x4a7   :  { %v1671_v1 = vpop.eup %1670 }
 0x4a8   :  { %v458_v2 = vadd.f32 1.0, %v1671_v1  ;;  %v786_v1 = vld [vmem:[#allocation2 + $0x8] sm:$0x3] }
 0x4aa   :  { %1672 = vrcp.f32 %v458_v2 }
 0x4b4   :  { %v1673_v3 = vpop.eup %1672 }
 0x4b5   :  { %v473_v9 = vsub.f32 1.0, %v1673_v3  ;;  %v479_v11 = vmul.f32 %v1673_v3, %v1878_v57 }
 0x50d   :  { %v464_v4 = vpop.permute.xlu1 %463 }
 0x50e   :  { %v466_v5 = vmul.f32 %v1673_v3, %v464_v4 }
 0x510   :  { %468 = vrot.lane.b32.xlu0 %v466_v5, %s1740_s11 }
 0x582   :  { %v469_v6 = vpop.permute.xlu0 %468 }
 0x583   :  { %v471_v7 = vadd.f32 %v469_v6, %v381_v62 }
 0x585   :  { %1674 = vtanh.f32 %v471_v7 }
 0x58f   :  { %v1675_v8 = vpop.eup %1674 }
 0x590   :  { %475 = vrot.lane.b32.xlu1 %v1675_v8, %s1741_s4 }
 0x602   :  { %v476_v10 = vpop.permute.xlu1 %475 }
 0x603   :  { %v478_v12 = vmul.f32 %v476_v10, %v473_v9 }
 0x605   :  { %v1898_v13 = vadd.f32 %v479_v11, %v478_v12 }
 0x607   :  { %482 = vrot.lane.b32.xlu0 %v1898_v13, %s1741_s4 }
 0x679   :  { %v483_v14 = vpop.permute.xlu0 %482 }
 0x67a   :  { %1361 = vst.msk [vmem:[%s2101_s7 + $0x2] sm:$0x3] %vm351_vm7, %v483_v14  ;;  %1502 = vmatmul.mubr.msk.f32.vlgmr.msra.gmra.mrb[4].mxu0 %vm238_vm8, %v483_v14 }
 0x67b   :  { %1601 = vmatpush3.bf16.msra.mxu0 %v1823_v16  ;;  %1523 = vmatprep.mubr.msk.f32.mxu0 %vm1738_vm0, %v1739_v18 }
 0x67c   :  { %1602 = vmatprep.subr.bf16.mxu0 %v1737_v15 }
 0x67f   :  { %1604 = vmatpush3.bf16.msra.mxu0 %v1834_v20 }
 0x680   :  { %1611 = vmatprep.subr.bf16.mxu0 %v1737_v15 }
 0x74d   :  { %v585_v17 = vpop.f32.mrb[4].mxu0 }
 0x74e   :  { %v596_v19 = vadd.f32 %v585_v17, %v1863_v33  ;;  %v1503_v21 = vpop.f32.mrb[5].mxu0  ;;  %v589_v23 = vadd.f32 %v585_v17, %v516_v22 }
 0x750   :  { %598 = vrot.lane.b32.xlu1 %v596_v19, %s1740_s11  ;;  %v1365_v24 = vmul.f32 -1.442695, %v589_v23 }
 0x752   :  { %1676 = vpow2.f32 %v1365_v24 }
 0x75c   :  { %v1677_v26 = vpop.eup %1676 }
 0x75d   :  { %v593_v27 = vadd.f32 1.0, %v1677_v26 }
 0x75f   :  { %1678 = vrcp.f32 %v593_v27  ;;  %v921_v27 = vld [vmem:[#allocation2 + $0xa] sm:$0x3] }
 0x769   :  { %v1679_v28 = vpop.eup %1678 }
 0x76a   :  { %v608_v35 = vsub.f32 1.0, %v1679_v28  ;;  %v614_v37 = vmul.f32 %v1679_v28, %v1898_v13 }
 0x7c2   :  { %v599_v29 = vpop.permute.xlu1 %598 }
 0x7c3   :  { %v601_v30 = vmul.f32 %v1679_v28, %v599_v29 }
 0x7c5   :  { %603 = vrot.lane.b32.xlu0 %v601_v30, %s1740_s11 }
 0x837   :  { %v604_v31 = vpop.permute.xlu0 %603 }
 0x838   :  { %v606_v32 = vadd.f32 %v604_v31, %v516_v22 }
 0x83a   :  { %1680 = vtanh.f32 %v606_v32 }
 0x844   :  { %v1681_v34 = vpop.eup %1680 }
 0x845   :  { %610 = vrot.lane.b32.xlu1 %v1681_v34, %s1741_s4 }
 0x8b7   :  { %v611_v36 = vpop.permute.xlu1 %610 }
 0x8b8   :  { %v613_v38 = vmul.f32 %v611_v36, %v608_v35 }
 0x8ba   :  { %v1918_v39 = vadd.f32 %v614_v37, %v613_v38 }
 0x8bc   :  { %617 = vrot.lane.b32.xlu0 %v1918_v39, %s1741_s4 }
 0x92e   :  { %v618_v40 = vpop.permute.xlu0 %617 }
 0x92f   :  { %1366 = vst.msk [vmem:[%s2101_s7 + $0x4] sm:$0x3] %vm351_vm7, %v618_v40  ;;  %1513 = vmatmul.mubr.msk.f32.vlgmr.msra.gmra.mrb[4].mxu1 %vm238_vm8, %v618_v40 }
 0x930   :  { %1607 = vmatpush3.bf16.msra.mxu1 %v1823_v16  ;;  %1534 = vmatprep.mubr.msk.f32.mxu1 %vm1738_vm0, %v1739_v18 }
 0x931   :  { %1608 = vmatprep.subr.bf16.mxu1 %v1737_v15 }
 0x934   :  { %1610 = vmatpush3.bf16.msra.mxu1 %v1834_v20 }
 0x935   :  { %1617 = vmatprep.subr.bf16.mxu1 %v1737_v15 }
 0xa02   :  { %v720_v41 = vpop.f32.mrb[4].mxu1 }
 0xa03   :  { %v731_v42 = vadd.f32 %v720_v41, %v1863_v33  ;;  %v1514_v43 = vpop.f32.mrb[5].mxu1  ;;  %v724_v45 = vadd.f32 %v720_v41, %v651_v44 }
 0xa05   :  { %733 = vrot.lane.b32.xlu1 %v731_v42, %s1740_s11  ;;  %v1370_v46 = vmul.f32 -1.442695, %v724_v45 }
 0xa07   :  { %1682 = vpow2.f32 %v1370_v46  ;;  %v1056_v46 = vld [vmem:[#allocation2 + $0xc] sm:$0x3] }
 0xa11   :  { %v1683_v47 = vpop.eup %1682 }
 0xa12   :  { %v728_v48 = vadd.f32 1.0, %v1683_v47 }
 0xa14   :  { %1684 = vrcp.f32 %v728_v48 }
 0xa1e   :  { %v1685_v49 = vpop.eup %1684 }
 0xa1f   :  { %v743_v55 = vsub.f32 1.0, %v1685_v49  ;;  %v749_v58 = vmul.f32 %v1685_v49, %v1918_v39 }
 0xa77   :  { %v734_v50 = vpop.permute.xlu1 %733 }
 0xa78   :  { %v736_v51 = vmul.f32 %v1685_v49, %v734_v50 }
 0xa7a   :  { %738 = vrot.lane.b32.xlu0 %v736_v51, %s1740_s11 }
 0xaec   :  { %v739_v52 = vpop.permute.xlu0 %738 }
 0xaed   :  { %v741_v53 = vadd.f32 %v739_v52, %v651_v44 }
 0xaef   :  { %1686 = vtanh.f32 %v741_v53 }
 0xaf9   :  { %v1687_v54 = vpop.eup %1686 }
 0xafa   :  { %745 = vrot.lane.b32.xlu1 %v1687_v54, %s1741_s4 }
 0xb6c   :  { %v746_v56 = vpop.permute.xlu1 %745 }
 0xb6d   :  { %v748_v59 = vmul.f32 %v746_v56, %v743_v55 }
 0xb6f   :  { %v1938_v60 = vadd.f32 %v749_v58, %v748_v59 }
 0xb71   :  { %752 = vrot.lane.b32.xlu0 %v1938_v60, %s1741_s4 }
 0xbe3   :  { %v753_v61 = vpop.permute.xlu0 %752 }
 0xbe4   :  { %1371 = vst.msk [vmem:[%s2101_s7 + $0x6] sm:$0x3] %vm351_vm7, %v753_v61  ;;  %1524 = vmatmul.mubr.msk.f32.vlgmr.msra.gmra.mrb[6].mxu0 %vm238_vm8, %v753_v61 }
 0xbe5   :  { %1613 = vmatpush3.bf16.msra.mxu0 %v1823_v16  ;;  %1545 = vmatprep.mubr.msk.f32.mxu0 %vm1738_vm0, %v1739_v18 }
 0xbe6   :  { %1614 = vmatprep.subr.bf16.mxu0 %v1737_v15 }
 0xbe9   :  { %1616 = vmatpush3.bf16.msra.mxu0 %v1834_v20 }
 0xcb7   :  { %v855_v62 = vpop.f32.mrb[6].mxu0 }
 0xcb8   :  { %v866_v63 = vadd.f32 %v855_v62, %v1863_v33  ;;  %v1525_v0 = vpop.f32.mrb[7].mxu0  ;;  %v859_v2 = vadd.f32 %v855_v62, %v786_v1 }
 0xcb9   :  { %v353_v0 = vld [vmem:[%s2100_s6] sm:$0x3] }
 0xcba   :  { %868 = vrot.lane.b32.xlu1 %v866_v63, %s1740_s11  ;;  %v1375_v3 = vmul.f32 -1.442695, %v859_v2 }
 0xcbc   :  { %1688 = vpow2.f32 %v1375_v3 }
 0xcc6   :  { %v1689_v4 = vpop.eup %1688 }
 0xcc7   :  { %v863_v5 = vadd.f32 1.0, %v1689_v4 }
 0xcc9   :  { %1690 = vrcp.f32 %v863_v5 }
 0xcd3   :  { %v1691_v6 = vpop.eup %1690 }
 0xcd4   :  { %v878_v12 = vsub.f32 1.0, %v1691_v6  ;;  %v884_v17 = vmul.f32 %v1691_v6, %v1938_v60 }
 0xd2c   :  { %v869_v7 = vpop.permute.xlu1 %868 }
 0xd2d   :  { %v871_v8 = vmul.f32 %v1691_v6, %v869_v7  ;;  %v1362_v6 = vld [vmem:[%s2100_s6 + $0x2] sm:$0x3]  ;;  %v1372_v7 = vld [vmem:[%s2100_s6 + $0x6] sm:$0x3] }
 0xd2f   :  { %873 = vrot.lane.b32.xlu0 %v871_v8, %s1740_s11  ;;  %v1377_v8 = vld [vmem:[%s2100_s6 + $0x8] sm:$0x3] }
 0xda1   :  { %v874_v9 = vpop.permute.xlu0 %873 }
 0xda2   :  { %v876_v10 = vadd.f32 %v874_v9, %v786_v1  ;;  %v1367_v1 = vld [vmem:[%s2100_s6 + $0x4] sm:$0x3]  ;;  %v1191_v9 = vld [vmem:[#allocation2 + $0xe] sm:$0x3] }
 0xda4   :  { %1692 = vtanh.f32 %v876_v10 }
 0xdae   :  { %v1693_v11 = vpop.eup %1692 }
 0xdaf   :  { %880 = vrot.lane.b32.xlu1 %v1693_v11, %s1741_s4 }
 0xe21   :  { %v881_v14 = vpop.permute.xlu1 %880 }
 0xe22   :  { %v883_v19 = vmul.f32 %v881_v14, %v878_v12 }
 0xe24   :  { %v1957_v21 = vadd.f32 %v884_v17, %v883_v19 }
 0xe26   :  { %887 = vrot.lane.b32.xlu0 %v1957_v21, %s1741_s4 }
 0xe98   :  { %v888_v22 = vpop.permute.xlu0 %887 }
 0xe99   :  { %1376 = vst.msk [vmem:[%s2101_s7 + $0x8] sm:$0x3] %vm351_vm7, %v888_v22  ;;  %1535 = vmatmul.mubr.msk.f32.vlgmr.msra.gmra.mrb[6].mxu1 %vm238_vm8, %v888_v22 }
 0xe9a   :  { %1619 = vmatpush3.bf16.msra.mxu1 %v1823_v16  ;;  %1556 = vmatprep.mubr.msk.f32.mxu1 %vm1738_vm0, %v1739_v18 }
 0xe9b   :  { %1620 = vmatprep.subr.bf16.mxu1 %v1737_v15 }
 0xe9e   :  { %1622 = vmatpush3.bf16.msra.mxu1 %v1834_v20 }
 0xf6c   :  { %v990_v23 = vpop.f32.mrb[6].mxu1 }
 0xf6d   :  { %v1001_v24 = vadd.f32 %v990_v23, %v1863_v33  ;;  %v1536_v26 = vpop.f32.mrb[7].mxu1  ;;  %v994_v28 = vadd.f32 %v990_v23, %v921_v27  ;;  %v1382_v23 = vld [vmem:[%s2100_s6 + $0xa] sm:$0x3] }
 0xf6f   :  { %1003 = vrot.lane.b32.xlu1 %v1001_v24, %s1740_s11  ;;  %v1380_v29 = vmul.f32 -1.442695, %v994_v28  ;;  %v1392_v24 = vld [vmem:[%s2100_s6 + $0xe] sm:$0x3] }
 0xf71   :  { %1694 = vpow2.f32 %v1380_v29 }
 0xf7b   :  { %v1695_v30 = vpop.eup %1694 }
 0xf7c   :  { %v998_v31 = vadd.f32 1.0, %v1695_v30 }
 0xf7e   :  { %1696 = vrcp.f32 %v998_v31 }
 0xf88   :  { %v1697_v16 = vpop.eup %1696 }
 0xf89   :  { %v1013_v36 = vsub.f32 1.0, %v1697_v16  ;;  %v1019_v38 = vmul.f32 %v1697_v16, %v1957_v21 }
 0xfe1   :  { %v1004_v32 = vpop.permute.xlu1 %1003 }
 0xfe2   :  { %v1006_v34 = vmul.f32 %v1697_v16, %v1004_v32 }
 0xfe4   :  { %1008 = vrot.lane.b32.xlu0 %v1006_v34, %s1740_s11 }
0x1056   :  { %v1009_v15 = vpop.permute.xlu0 %1008 }
0x1057   :  { %v1011_v20 = vadd.f32 %v1009_v15, %v921_v27 }
0x1059   :  { %1698 = vtanh.f32 %v1011_v20 }
0x1063   :  { %v1699_v35 = vpop.eup %1698 }
0x1064   :  { %1015 = vrot.lane.b32.xlu1 %v1699_v35, %s1741_s4 }
0x10d6   :  { %v1016_v37 = vpop.permute.xlu1 %1015 }
0x10d7   :  { %v1018_v40 = vmul.f32 %v1016_v37, %v1013_v36 }
0x10d9   :  { %v1976_v41 = vadd.f32 %v1019_v38, %v1018_v40 }
0x10db   :  { %1022 = vrot.lane.b32.xlu0 %v1976_v41, %s1741_s4 }
0x114d   :  { %v1023_v42 = vpop.permute.xlu0 %1022 }
0x114e   :  { %1381 = vst.msk [vmem:[%s2101_s7 + $0xa] sm:$0x3] %vm351_vm7, %v1023_v42  ;;  %1546 = vmatmul.mubr.msk.f32.vlgmr.msra.gmra.mrb[8].mxu0 %vm238_vm8, %v1023_v42 }
0x1221   :  { %v1125_v43 = vpop.f32.mrb[8].mxu0 }
0x1222   :  { %v1136_v44 = vadd.f32 %v1125_v43, %v1863_v33  ;;  %v1547_v45 = vpop.f32.mrb[9].mxu0  ;;  %v1129_v47 = vadd.f32 %v1125_v43, %v1056_v46 }
0x1224   :  { %1138 = vrot.lane.b32.xlu1 %v1136_v44, %s1740_s11  ;;  %v1385_v48 = vmul.f32 -1.442695, %v1129_v47 }
0x1226   :  { %1700 = vpow2.f32 %v1385_v48 }
0x1230   :  { %v1701_v49 = vpop.eup %1700 }
0x1231   :  { %v1133_v50 = vadd.f32 1.0, %v1701_v49 }
0x1233   :  { %1702 = vrcp.f32 %v1133_v50 }
0x123d   :  { %v1703_v51 = vpop.eup %1702 }
0x123e   :  { %v1148_v58 = vsub.f32 1.0, %v1703_v51  ;;  %v1154_v61 = vmul.f32 %v1703_v51, %v1976_v41 }
0x1296   :  { %v1139_v52 = vpop.permute.xlu1 %1138 }
0x1297   :  { %v1141_v53 = vmul.f32 %v1703_v51, %v1139_v52 }
0x1299   :  { %1143 = vrot.lane.b32.xlu0 %v1141_v53, %s1740_s11 }
0x130b   :  { %v1144_v54 = vpop.permute.xlu0 %1143 }
0x130c   :  { %v1146_v55 = vadd.f32 %v1144_v54, %v1056_v46 }
0x130e   :  { %1704 = vtanh.f32 %v1146_v55 }
0x1318   :  { %v1705_v56 = vpop.eup %1704 }
0x1319   :  { %1150 = vrot.lane.b32.xlu1 %v1705_v56, %s1741_s4 }
0x138b   :  { %v1151_v59 = vpop.permute.xlu1 %1150 }
0x138c   :  { %v1153_v62 = vmul.f32 %v1151_v59, %v1148_v58 }
0x138e   :  { %v1990_v63 = vadd.f32 %v1154_v61, %v1153_v62 }
0x1390   :  { %1157 = vrot.lane.b32.xlu0 %v1990_v63, %s1741_s4 }
0x1394   :  { %355 = vperm.xlu0 %1647, %v353_v0  }
0x1398   :  { %625 = vperm.xlu0 %1647, %v1367_v1  }
0x1402   :  { %v1158_v2 = vpop.permute.xlu0 %1157 }
0x1403   :  { %1386 = vst.msk [vmem:[%s2101_s7 + $0xc] sm:$0x3] %vm351_vm7, %v1158_v2  ;;  %1557 = vmatmul.mubr.msk.f32.vlgmr.msra.gmra.mrb[8].mxu1 %vm238_vm8, %v1158_v2 }
0x1413   :  { %v356_v26 = vpop.permute.xlu0 %355 }
0x1414   :  { %vm357_vm9 = vcmp.eq.s32.totalorder %v1852_v25, %v356_v26 }
0x1415   :  { %v1358_v29 = vsel %vm357_vm9, 1.0, %v1739_v18 }
0x1417   :  { %v626_v27 = vpop.permute.xlu0 %625 }
0x1418   :  { %vm627_vm11 = vcmp.eq.s32.totalorder %v1852_v25, %v626_v27 }
0x1419   :  { %v1368_v32 = vsel %vm627_vm11, 1.0, %v1739_v18 }
0x14d6   :  { %v1260_v3 = vpop.f32.mrb[8].mxu1 }
0x14d7   :  { %v1271_v4 = vadd.f32 %v1260_v3, %v1863_v33  ;;  %v1558_v5 = vpop.f32.mrb[9].mxu1  ;;  %v1387_v33 = vld [vmem:[%s2100_s6 + $0xc] sm:$0x3]  ;;  %v1264_v10 = vadd.f32 %v1260_v3, %v1191_v9 }
0x14d9   :  { %1273 = vrot.lane.b32.xlu1 %v1271_v4, %s1740_s11  ;;  %v1390_v11 = vmul.f32 -1.442695, %v1264_v10 }
0x14db   :  { %1706 = vpow2.f32 %v1390_v11 }
0x14dd   :  { %490 = vperm.xlu1 %1648, %v1362_v6  }
0x14e1   :  { %760 = vperm.xlu1 %1648, %v1372_v7  }
0x14e5   :  { %895 = vperm.xlu1 %1648, %v1377_v8   ;;  %v1707_v12 = vpop.eup %1706 }
0x14e6   :  { %v1268_v14 = vadd.f32 1.0, %v1707_v12 }
0x14e8   :  { %1708 = vrcp.f32 %v1268_v14 }
0x14e9   :  { %1165 = vperm.xlu1 %1648, %v1387_v33  }
0x14f2   :  { %v2019_v17 = vpop.eup %1708 }
0x154b   :  { %v1274_v19 = vpop.permute.xlu1 %1273 }
0x154c   :  { %v1276_v22 = vmul.f32 %v2019_v17, %v1274_v19 }
0x154e   :  { %1278 = vrot.lane.b32.xlu0 %v1276_v22, %s1740_s11  ;;  %s1742_s11 = smov 32  }
0x1552   :  { %1030 = vperm.xlu0 %1647, %v1382_v23  }
0x1556   :  { %1300 = vperm.xlu0 %1647, %v1392_v24  }
0x155c   :  { %v491_v28 = vpop.permute.xlu1 %490 }
0x155d   :  { %vm492_vm10 = vcmp.eq.s32.totalorder %v1852_v25, %v491_v28 }
0x155e   :  { %v1363_v30 = vsel %vm492_vm10, 1.0, %v1739_v18 }
0x155f   :  { %v1649_v31 = vpack.i.bf16 %v1363_v30, %v1358_v29 }
0x1560   :  { %v761_v16 = vpop.permute.xlu1 %760 }
0x1561   :  { %vm762_vm12 = vcmp.eq.s32.totalorder %v1852_v25, %v761_v16  ;;  %1650 = vrot.lane.b32.xlu1 %v1649_v31, %s1742_s11 }
0x1562   :  { %v1373_v34 = vsel %vm762_vm12, 1.0, %v1739_v18 }
0x1563   :  { %v1654_v15 = vpack.i.bf16 %v1373_v34, %v1368_v32 }
0x1564   :  { %v896_v36 = vpop.permute.xlu1 %895 }
0x1565   :  { %1655 = vrot.lane.b32.xlu0 %v1654_v15, %s1742_s11  ;;  %vm897_vm13 = vcmp.eq.s32.totalorder %v1852_v25, %v896_v36 }
0x1566   :  { %v1378_v42 = vsel %vm897_vm13, 1.0, %v1739_v18 }
0x1568   :  { %v1166_v38 = vpop.permute.xlu1 %1165 }
0x1569   :  { %vm1167_vm15 = vcmp.eq.s32.totalorder %v1852_v25, %v1166_v38 }
0x156a   :  { %v1388_v50 = vsel %vm1167_vm15, 1.0, %v1739_v18 }
0x15c0   :  { %v1279_v20 = vpop.permute.xlu0 %1278 }
0x15c1   :  { %v1281_v35 = vadd.f32 %v1279_v20, %v1191_v9 }
0x15c3   :  { %1710 = vtanh.f32 %v1281_v35 }
0x15cd   :  { %v1711_v37 = vpop.eup %1710 }
0x15ce   :  { %1285 = vrot.lane.b32.xlu0 %v1711_v37, %s1741_s4 }
0x15d1   :  { %v1031_v40 = vpop.permute.xlu0 %1030 }
0x15d2   :  { %vm1032_vm14 = vcmp.eq.s32.totalorder %v1852_v25, %v1031_v40 }
0x15d3   :  { %v1383_v43 = vsel %vm1032_vm14, 1.0, %v1739_v18  ;;  %v1651_v44 = vpop.permute.xlu1 %1650 }
0x15d4   :  { %v1659_v45 = vpack.i.bf16 %v1383_v43, %v1378_v42  ;;  %v1653_v47 = vunpack.i.h.bf16 %v1651_v44  ;;  %v1652_v49 = vunpack.i.l.bf16 %v1651_v44 }
0x15d5   :  { %v1301_v46 = vpop.permute.xlu0 %1300 }
0x15d6   :  { %vm1302_vm0 = vcmp.eq.s32.totalorder %v1852_v25, %v1301_v46  ;;  %1660 = vrot.lane.b32.xlu1 %v1659_v45, %s1742_s11  ;;  %v499_v52 = vmul.f32 %v1653_v47, %v1898_v13  ;;  %v364_v54 = vmul.f32 %v1652_v49, %v1878_v57  ;;  %v1283_v13 = vsub.f32 1.0, %v2019_v17 }
0x15d7   :  { %v1393_v48 = vsel %vm1302_vm0, 1.0, %v1739_v18 }
0x15d8   :  { %1306 = vrot.lane.b32.xlu0 %v1393_v48, %s1742_s11 }
0x15d9   :  { %v1656_v51 = vpop.permute.xlu0 %1655 }
0x15da   :  { %v1658_v53 = vunpack.i.h.bf16 %v1656_v51  ;;  %1171 = vrot.lane.b32.xlu1 %v1388_v50, %s1742_s11  ;;  %v1657_v55 = vunpack.i.l.bf16 %v1656_v51 }
0x15dc   :  { %501 = vrot.lane.b32.xlu0 %v499_v52, %s1741_s4  ;;  %v769_v25 = vmul.f32 %v1658_v53, %v1938_v60  ;;  %v634_v56 = vmul.f32 %v1657_v55, %v1918_v39  ;;  %v1289_v60 = vmul.f32 %v2019_v17, %v1990_v63 }
0x15de   :  { %366 = vrot.lane.b32.xlu1 %v364_v54, %s1741_s4 }
0x15e0   :  { %771 = vrot.lane.b32.xlu0 %v769_v25, %s1741_s4 }
0x15e2   :  { %636 = vrot.lane.b32.xlu1 %v634_v56, %s1741_s4 }
0x1640   :  { %v1286_v18 = vpop.permute.xlu0 %1285 }
0x1641   :  { %v1288_v59 = vmul.f32 %v1286_v18, %v1283_v13 }
0x1643   :  { %v1290_v2 = vadd.f32 %v1289_v60, %v1288_v59 }
0x1648   :  { %v1661_v58 = vpop.permute.xlu1 %1660 }
0x1649   :  { %v1663_v61 = vunpack.i.h.bf16 %v1661_v58  ;;  %v1662_v57 = vunpack.i.l.bf16 %v1661_v58 }
0x164a   :  { %v1307_v1 = vpop.permute.xlu0 %1306 }
0x164b   :  { %v1039_v62 = vmul.f32 %v1663_v61, %v1976_v41  ;;  %v904_v0 = vmul.f32 %v1662_v57, %v1957_v21  ;;  %v1309_v3 = vmul.f32 %v1307_v1, %v1290_v2 }
0x164c   :  { %v1172_v39 = vpop.permute.xlu1 %1171 }
0x164d   :  { %1041 = vrot.lane.b32.xlu0 %v1039_v62, %s1741_s4  ;;  %906 = vrot.lane.b32.xlu1 %v904_v0, %s1741_s4  ;;  %v1174_v4 = vmul.f32 %v1172_v39, %v1990_v63 }
0x164e   :  { %v502_v5 = vpop.permute.xlu0 %501 }
0x164f   :  { %v504_v21 = vsel %vm351_vm7, %v502_v5, 0.0 }
0x1650   :  { %v367_v41 = vpop.permute.xlu1 %366 }
0x1651   :  { %1311 = vrot.lane.b32.xlu0 %v1309_v3, %s1741_s4  ;;  %1176 = vrot.lane.b32.xlu1 %v1174_v4, %s1741_s4  ;;  %v369_v8 = vsel %vm351_vm7, %v367_v41, 0.0 }
0x1652   :  { %v772_v33 = vpop.permute.xlu0 %771 }
0x1653   :  { %v774_v9 = vsel %vm351_vm7, %v772_v33, 0.0 }
0x1654   :  { %v637_v6 = vpop.permute.xlu1 %636 }
0x1655   :  { %v639_v7 = vsel %vm351_vm7, %v637_v6, 0.0 }
0x1670   :  { %505 = vadd.xlane.f32.xlu0 %v504_v21 }
0x1674   :  { %640 = vadd.xlane.f32.xlu0 %v639_v7 }
0x1675   :  { %370 = vadd.xlane.f32.xlu1 %v369_v8 }
0x1679   :  { %775 = vadd.xlane.f32.xlu1 %v774_v9 }
0x16bf   :  { %v1042_v63 = vpop.permute.xlu0 %1041  ;;  %v907_v10 = vpop.permute.xlu1 %906 }
0x16c0   :  { %v1044_v11 = vsel %vm351_vm7, %v1042_v63, 0.0  ;;  %v909_v12 = vsel %vm351_vm7, %v907_v10, 0.0 }
0x16c1   :  { %1045 = vadd.xlane.f32.xlu1 %v1044_v11  ;;  %910 = vadd.xlane.f32.xlu0 %v909_v12 }
0x16c3   :  { %v1177_v14 = vpop.permute.xlu1 %1176  ;;  %v1312_v19 = vpop.permute.xlu0 %1311 }
0x16c4   :  { %v1179_v17 = vsel %vm351_vm7, %v1177_v14, 0.0  ;;  %v1314_v22 = vsel %vm351_vm7, %v1312_v19, 0.0 }
0x16c5   :  { %1180 = vadd.xlane.f32.xlu0 %v1179_v17 }
0x16c9   :  { %1315 = vadd.xlane.f32.xlu0 %v1314_v22 }
0x16d2   :  { %1292 = vrot.lane.b32.xlu1 %v1290_v2, %s1741_s4 }
0x16fd   :  { %v506_v23 = vpop.xlane.xlu0 %505 }
0x16fe   :  { %v507_v24 = vrot.slane %v506_v23, 4 }
0x1700   :  { %v508_v26 = vadd.f32 %v507_v24, %v506_v23 }
0x1701   :  { %v641_v27 = vpop.xlane.xlu0 %640 }
0x1702   :  { %v509_v28 = vrot.slane %v508_v26, 2  ;;  %v642_v29 = vrot.slane %v641_v27, 4  ;;  %v371_v30 = vpop.xlane.xlu1 %370 }
0x1703   :  { %v372_v31 = vrot.slane %v371_v30, 4 }
0x1704   :  { %v643_v16 = vadd.f32 %v642_v29, %v641_v27  ;;  %v510_v20 = vadd.f32 %v509_v28, %v508_v26 }
0x1705   :  { %v373_v32 = vadd.f32 %v372_v31, %v371_v30 }
0x1706   :  { %v644_v34 = vrot.slane %v643_v16, 2  ;;  %v776_v15 = vpop.xlane.xlu1 %775  ;;  %v511_v42 = vrot.slane %v510_v20, 1 }
0x1707   :  { %v374_v35 = vrot.slane %v373_v32, 2  ;;  %v777_v36 = vrot.slane %v776_v15, 4 }
0x1708   :  { %v645_v37 = vadd.f32 %v644_v34, %v643_v16  ;;  %v512_v49 = vadd.f32 %v511_v42, %v510_v20 }
0x1709   :  { %v778_v38 = vadd.f32 %v777_v36, %v776_v15  ;;  %v375_v40 = vadd.f32 %v374_v35, %v373_v32 }
0x170a   :  { %v646_v43 = vrot.slane %v645_v37, 1 }
0x170b   :  { %v779_v44 = vrot.slane %v778_v38, 2  ;;  %v376_v45 = vrot.slane %v375_v40, 1 }
0x170c   :  { %v647_v47 = vadd.f32 %v646_v43, %v645_v37 }
0x170d   :  { %v377_v46 = vadd.f32 %v376_v45, %v375_v40  ;;  %v780_v48 = vadd.f32 %v779_v44, %v778_v38 }
0x170f   :  { %1623 = vpush %v377_v46  ;;  %v781_v50 = vrot.slane %v780_v48, 1 }
0x1710   :  { %1625 = vpush %v512_v49 }
0x1711   :  { %1627 = vpush %v647_v47  ;;  %v782_v51 = vadd.f32 %v781_v50, %v780_v48 }
0x1713   :  { %1629 = vpush %v782_v51 }
0x174e   :  { %v911_v52 = vpop.xlane.xlu0 %910  ;;  %v1046_v53 = vpop.xlane.xlu1 %1045 }
0x174f   :  { %v912_v54 = vrot.slane %v911_v52, 4  ;;  %v1047_v55 = vrot.slane %v1046_v53, 4 }
0x1751   :  { %v913_v25 = vadd.f32 %v912_v54, %v911_v52  ;;  %v1048_v56 = vadd.f32 %v1047_v55, %v1046_v53 }
0x1752   :  { %v1181_v18 = vpop.xlane.xlu0 %1180  ;;  %v1293_v13 = vpop.permute.xlu1 %1292 }
0x1753   :  { %v914_v58 = vrot.slane %v913_v25, 2  ;;  %v1049_v59 = vrot.slane %v1048_v56, 2  ;;  %v1182_v61 = vrot.slane %v1181_v18, 4  ;;  %1391 = vst.msk [vmem:[%s2101_s7 + $0xe] sm:$0x3] %vm351_vm7, %v1293_v13  ;;  %s1624_s7 = spop %1623 }
0x1754   :  { %s1626_s17 = spop %1625  ;;  %v379_v10 = vstv %s1624_s7 }
0x1755   :  { %v1183_v57 = vadd.f32 %v1182_v61, %v1181_v18  ;;  %v915_v62 = vadd.f32 %v914_v58, %v913_v25  ;;  %v1050_v0 = vadd.f32 %v1049_v59, %v1048_v56  ;;  %v514_v11 = vstv %s1626_s17  ;;  %s1628_s18 = spop %1627 }
0x1756   :  { %v1316_v60 = vpop.xlane.xlu0 %1315  ;;  %v515_v12 = vadd.f32 %v514_v11, %v379_v10  ;;  %s1630_s19 = spop %1629  ;;  %v649_v14 = vstv %s1628_s18 }
0x1757   :  { %v1184_v1 = vrot.slane %v1183_v57, 2  ;;  %v1317_v39 = vrot.slane %v1316_v60, 4  ;;  %v916_v2 = vrot.slane %v915_v62, 1  ;;  %v1051_v3 = vrot.slane %v1050_v0, 1 }
0x1758   :  { %v650_v17 = vadd.f32 %v649_v14, %v515_v12  ;;  %v784_v19 = vstv %s1630_s19 }
0x1759   :  { %v1318_v4 = vadd.f32 %v1317_v39, %v1316_v60  ;;  %v917_v41 = vadd.f32 %v916_v2, %v915_v62  ;;  %v1052_v5 = vadd.f32 %v1051_v3, %v1050_v0  ;;  %v1185_v21 = vadd.f32 %v1184_v1, %v1183_v57 }
0x175a   :  { %v785_v22 = vadd.f32 %v784_v19, %v650_v17 }
0x175b   :  { %v1319_v6 = vrot.slane %v1318_v4, 2  ;;  %1631 = vpush %v917_v41  ;;  %v1186_v7 = vrot.slane %v1185_v21, 1 }
0x175c   :  { %1633 = vpush %v1052_v5 }
0x175d   :  { %v1320_v8 = vadd.f32 %v1319_v6, %v1318_v4  ;;  %v1187_v33 = vadd.f32 %v1186_v7, %v1185_v21 }
0x175f   :  { %1635 = vpush %v1187_v33  ;;  %v1321_v9 = vrot.slane %v1320_v8, 1 }
0x1761   :  { %v1322_v63 = vadd.f32 %v1321_v9, %v1320_v8 }
0x1763   :  { %1637 = vpush %v1322_v63 }
0x178c   :  { %s1632_s20 = spop %1631 }
0x178d   :  { %v919_v23 = vstv %s1632_s20  ;;  %s1634_s21 = spop %1633 }
0x178e   :  { %v920_v24 = vadd.f32 %v919_v23, %v785_v22  ;;  %v1054_v26 = vstv %s1634_s21 }
0x1790   :  { %v1055_v27 = vadd.f32 %v1054_v26, %v920_v24  ;;  %s1636_s22 = spop %1635 }
0x1791   :  { %v1189_v28 = vstv %s1636_s22 }
0x1792   :  { %v1190_v29 = vadd.f32 %v1189_v28, %v1055_v27 }
0x1794   :  { %s1638_s23 = spop %1637 }
0x1795   :  { %v1324_v30 = vstv %s1638_s23 }
0x1796   :  { %v1325_v31 = vadd.f32 %v1324_v30, %v1190_v29 }
0x1798   :  { %v1326_v16 = vsub.f32 0.0, %v1325_v31 }
0x179a   :  { %v1327_v32 = vmul.f32 0.0625, %v1326_v16 }
0x179c   :  { %1329 = vst.msk [vmem:[#allocation3] sm:$0x1] %vm1328_vm1, %v1327_v32 }
0x179d   :  { %1723 = shalt.err (!%p1720_p4)
}
0x179e   :  { %s1724_s29 = scalar_lea.hbm %s2102_s8, 16 }
0x179f   :  { %p1725_p5 = scmp.ne.s32.totalorder %s2102_s8, %s1724_s29  ;;  %p1728_p6 = scmp.lt.u32.totalorder %s1724_s29, %s2102_s8 }
0x17a1   :  { %p1730_p7 = pnand %p1728_p6, %p1725_p5 }
0x17a3   :  { %1733 = shalt.err (!%p1730_p7)
}
0x17a4   :  { %1341 = dma.vmem_to_hbm [thread:$0]  %s1339_s0, 16, %s2102_s8, [#allocation4]  }
0x17a5   :  { %1734 = dma.done.wait [#allocation4], 16  }
0x17a6   :  { %1735 = vsyncadd [#allocation4], 4294967280 }
0x17a7   :  { %1347 = vsyncpa [#allocation4], 1 }

</bundles_post_ra>
